<compile_context>
chip_gen: v7x
topology: tpu7x:2x2x1
jax: 0.10.0
libtpu: 0.0.40
codegen_flags: <defaults>
</compile_context>

<pallas_src>
import functools

import jax
import jax.numpy as jnp
import numpy as np
from jax.experimental import pallas as pl
from jax.experimental.pallas import tpu as pltpu  # noqa: F401  (TPU backend)

NTYPES = ("stock", "financial", "macro", "news", "policy")
IN_DIMS = {"stock": 5, "financial": 16, "macro": 21, "news": 768, "policy": 768}
TIDX = {t: i for i, t in enumerate(NTYPES)}
SRCS_BY_DST = {d: [s for s in NTYPES if s != d] for d in NTYPES}

# -------------------- static sizes & packed-operand layout -------------------
N = 8          # nodes per type
H = 32         # hidden_size
C = 4          # num_classes
T = len(NTYPES)
WIDE = 256     # 5*H = 160 destination-block lanes, padded to a 128-multiple

# per-source feature / conv1-weight K blocks (128-lane aligned)
FPAD = {"stock": 128, "financial": 128, "macro": 128, "news": 768, "policy": 768}
X_OFF = {}
_o = 0
for _t in NTYPES:
    X_OFF[_t] = _o
    _o += FPAD[_t]
X_TOT = _o                      # 1920

# bf16 weight-slab row layout
W2_ROW = X_TOT                  # wide conv2 weight          [WIDE, WIDE]
FOLD_ROW = W2_ROW + WIDE        # folded (fold | fold @ Wfc) [WIDE, WIDE]
W_ROWS = FOLD_ROW + WIDE        # 2432

# f32 constant-slab row layout
MASK_ROW = 0                    # 0/1 mask of live diagonal blocks   [T*N, WIDE]
B1_ROW = T * N                  # conv1 per-destination bias sums    [T*N, WIDE]
Q_ROW = 2 * T * N               # pooled-conv2 column-sum weights    [T*N, WIDE]
BIAS_ROW = 3 * T * N            # pooled conv2 bias + fc bias        [1,   WIDE]
C_ROWS = BIAS_ROW + 1           # 121


# -----------------------------------------------------------------------------
# The single fused kernel: conv1 -> conv2 -> cross-type mix -> mean_nodes -> fc
# -----------------------------------------------------------------------------
def fused_kernel(x_ref, w_ref, a_ref, c_ref, o_ref):
    # ---- conv1: per-source grouped matmuls (bf16 in, f32 acc) ---------------
    z_blocks = []
    for t in NTYPES:                                     # statically unrolled
        xo, fw = X_OFF[t], FPAD[t]
        z_blocks.append(
            jnp.dot(x_ref[:, xo:xo + fw], w_ref[xo:xo + fw, :],
                    preferred_element_type=jnp.float32))            # [N, WIDE]
    # sublane-stack the per-source outputs (no lane slicing / reshapes needed)
    zwide = jnp.concatenate(z_blocks, axis=0).astype(jnp.bfloat16)  # [T*N, WIDE]

    # ---- conv1 adjacency mix: one block matmul, keep diag blocks, add bias --
    g = jnp.dot(a_ref[...], zwide, preferred_element_type=jnp.float32)
    h1w = (g * c_ref[MASK_ROW:MASK_ROW + T * N, :]
           + c_ref[B1_ROW:B1_ROW + T * N, :])                       # [T*N, WIDE]

    # ---- conv2 per-relation transform: one wide matmul -----------------------
    p = jnp.dot(h1w.astype(jnp.bfloat16), w_ref[W2_ROW:W2_ROW + WIDE, :],
                preferred_element_type=jnp.float32)                 # [T*N, WIDE]

    # ---- conv2 adjacency mix + /T + mean_nodes collapsed into weighted rowsum
    wsum = jnp.sum(p * c_ref[Q_ROW:Q_ROW + T * N, :],
                   axis=0, keepdims=True)                           # [1, WIDE]

    # ---- fold destination blocks, add pooled conv2 bias + fc (host-folded) ---
    o_ref[...] = (jnp.dot(wsum.astype(jnp.bfloat16),
                          w_ref[FOLD_ROW:FOLD_ROW + WIDE, :],
                          preferred_element_type=jnp.float32)
                  + c_ref[BIAS_ROW:BIAS_ROW + 1, :])                # [1, WIDE]


def hetero_forward(xslab, wslab, amix, cslab):
    out = pl.pallas_call(
        fused_kernel,
        out_shape=jax.ShapeDtypeStruct((1, WIDE), jnp.float32),
    )(xslab, wslab, amix, cslab)
    # cols 0:H -> dgl_m, cols 128:128+C -> logits
    return out[:, :H], out[:, 128:128 + C]


# -----------------------------------------------------------------------------
# Host-side glue: graph construction / parameter packing (plain numpy / JAX)
# -----------------------------------------------------------------------------
def build_norm_adj(key, n):
    e = jax.random.bernoulli(key, 0.5, (n, n)).astype(jnp.float32)   # [dst, src]
    d_in = jnp.maximum(e.sum(axis=1), 1.0)      # in-degree of dst (clamped)
    d_out = jnp.maximum(e.sum(axis=0), 1.0)     # out-degree of src (clamped)
    return e * (d_in ** -0.5)[:, None] * (d_out ** -0.5)[None, :]


if __name__ == "__main__":
    key = jax.random.PRNGKey(0)
    keys = jax.random.split(key, 256)
    kit = iter(range(256))
    nk = lambda: keys[next(kit)]

    # node features at their true input dims
    feats = {t: jax.random.normal(nk(), (N, IN_DIMS[t]), jnp.float32) * 0.1
             for t in NTYPES}

    # per-relation dense normalized adjacency (same graph for conv1 and conv2)
    adj = {(d, s): build_norm_adj(nk(), N)
           for d in NTYPES for s in SRCS_BY_DST[d]}

    # per-relation GraphConv parameters + final Linear
    w1, b1, w2, b2 = {}, {}, {}, {}
    for d in NTYPES:
        for s in SRCS_BY_DST[d]:
            w1[(d, s)] = jax.random.normal(nk(), (IN_DIMS[s], H), jnp.float32) * 0.1
            b1[(d, s)] = jax.random.normal(nk(), (1, H), jnp.float32) * 0.01
            w2[(d, s)] = jax.random.normal(nk(), (H, H), jnp.float32) * 0.1
            b2[(d, s)] = jax.random.normal(nk(), (1, H), jnp.float32) * 0.01
    Wfc = jax.random.normal(nk(), (H, C), jnp.float32) * 0.1
    Bfc = jax.random.normal(nk(), (1, C), jnp.float32) * 0.01

    inv_tn = 1.0 / (T * N)
    wfc_np = np.asarray(Wfc, np.float32)

    # ---------------- operand 1: bf16 feature slab [N, 1920] ----------------
    xslab_np = np.zeros((N, X_TOT), np.float32)
    for t in NTYPES:
        xslab_np[:, X_OFF[t]:X_OFF[t] + IN_DIMS[t]] = np.asarray(feats[t])
    xslab = jnp.asarray(xslab_np, jnp.bfloat16)

    # ---------------- operand 2: bf16 weight slab [2432, 256] ----------------
    # rows [X_OFF[s] : +FPAD[s]]: wide conv1 weight of source s (dest block at
    #   lanes TIDX[d]*H); rows [W2_ROW:+WIDE]: wide conv2 weight; rows
    #   [FOLD_ROW:+WIDE]: (inv_tn*fold | inv_tn*fold@Wfc) for the fused tail.
    wslab_np = np.zeros((W_ROWS, WIDE), np.float32)
    for s in NTYPES:
        for d in NTYPES:
            if d == s:
                continue
            wslab_np[X_OFF[s]:X_OFF[s] + IN_DIMS[s],
                     TIDX[d] * H:(TIDX[d] + 1) * H] = np.asarray(w1[(d, s)])
            wslab_np[W2_ROW + TIDX[s] * H:W2_ROW + (TIDX[s] + 1) * H,
                     TIDX[d] * H:(TIDX[d] + 1) * H] = np.asarray(w2[(d, s)])
    for t in range(T):
        rows = slice(FOLD_ROW + t * H, FOLD_ROW + (t + 1) * H)
        wslab_np[rows, :H] = inv_tn * np.eye(H, dtype=np.float32)     # -> dgl_m
        wslab_np[rows, 128:128 + C] = inv_tn * wfc_np                 # -> logits
    wslab = jnp.asarray(wslab_np, jnp.bfloat16)

    # ---------------- operand 3: bf16 block adjacency [5N, 5N] ----------------
    amix_np = np.zeros((T * N, T * N), np.float32)
    for d in NTYPES:
        for s in SRCS_BY_DST[d]:
            amix_np[TIDX[d] * N:(TIDX[d] + 1) * N,
                    TIDX[s] * N:(TIDX[s] + 1) * N] = np.asarray(adj[(d, s)])
    amix = jnp.asarray(amix_np, jnp.bfloat16)

    # ---------------- operand 4: f32 constant slab [121, 256] ----------------
    cslab_np = np.zeros((C_ROWS, WIDE), np.float32)
    for d in NTYPES:
        di = TIDX[d]
        cslab_np[MASK_ROW + di * N:MASK_ROW + (di + 1) * N,
                 di * H:(di + 1) * H] = 1.0
        b1sum = sum(np.asarray(b1[(d, s)], np.float32) for s in SRCS_BY_DST[d])
        cslab_np[B1_ROW + di * N:B1_ROW + (di + 1) * N,
                 di * H:(di + 1) * H] = b1sum
    for s in NTYPES:
        si = TIDX[s]
        for d in NTYPES:
            if d == s:
                continue
            di = TIDX[d]
            col = np.asarray(adj[(d, s)], np.float32).sum(axis=0)     # per src node
            cslab_np[Q_ROW + si * N:Q_ROW + (si + 1) * N,
                     di * H:(di + 1) * H] = col[:, None]
    b2pool = N * sum(sum(np.asarray(b2[(d, s)], np.float32)
                         for s in SRCS_BY_DST[d]) for d in NTYPES)    # [1, H]
    cslab_np[BIAS_ROW, :H] = inv_tn * b2pool[0]
    cslab_np[BIAS_ROW, 128:128 + C] = (inv_tn * (b2pool @ wfc_np)
                                       + np.asarray(Bfc))[0]
    cslab = jnp.asarray(cslab_np, jnp.float32)

    # ---------------- forward: single fused Pallas kernel ----------------
    dgl_m, output = hetero_forward(xslab, wslab, amix, cslab)
    dgl_m, output = jax.block_until_ready((dgl_m, output))

    # ---------------- pure-JAX reference check ----------------
    # Reference uses the same bf16-rounded tensors the kernel consumes (upcast
    # to f32), so it validates the kernel math / algebraic folding itself.
    def rt(x):
        return jnp.asarray(x, jnp.bfloat16).astype(jnp.float32)

    adj_q = {k: rt(v) for k, v in adj.items()}
    x_q = {t: rt(feats[t]) for t in NTYPES}
    w1_q = {k: rt(v) for k, v in w1.items()}
    w2_q = {k: rt(v) for k, v in w2.items()}

    def ref_layer(x_by_src, w_rel, b_rel):
        out = {}
        for d in NTYPES:
            acc = jnp.zeros((N, H), jnp.float32)
            for s in SRCS_BY_DST[d]:
                acc = acc + adj_q[(d, s)] @ (x_by_src[s] @ w_rel[(d, s)]) + b_rel[(d, s)]
            out[d] = acc
        return out

    rh1 = ref_layer(x_q, w1_q, b1)
    rh2 = ref_layer(rh1, w2_q, b2)
    r_total = functools.reduce(lambda a, b: a + b, (rh2[t] for t in NTYPES))
    r_m = jnp.sum(r_total, axis=0, keepdims=True) / (T * N)   # h/T then mean_nodes
    r_out = r_m @ Wfc + Bfc

    assert np.allclose(np.asarray(dgl_m), np.asarray(r_m), atol=1e-2, rtol=1e-2)
    assert np.allclose(np.asarray(output), np.asarray(r_out), atol=1e-2, rtol=1e-2)

    print("KERNEL_OK")
</pallas_src>

<mosaic_0001>
module attributes {stable_mosaic.version = 11 : i64} {
  func.func @fused_kernel(%arg0: memref<8x1920xbf16, #tpu.memory_space<vmem>>, %arg1: memref<2432x256xbf16, #tpu.memory_space<vmem>>, %arg2: memref<40x40xbf16, #tpu.memory_space<vmem>>, %arg3: memref<121x256xf32, #tpu.memory_space<vmem>>, %arg4: memref<1x256xf32, #tpu.memory_space<vmem>>) attributes {dimension_semantics = [], scalar_prefetch = 0 : i64, scratch_operands = 0 : i64, tpu.core_type = #tpu.core_type<tc>} {
    %c0 = arith.constant 0 : index
    %c0_0 = arith.constant 0 : index
    %0 = vector.load %arg0[%c0, %c0_0] : memref<8x1920xbf16, #tpu.memory_space<vmem>>, vector<8x128xbf16>
    %c0_1 = arith.constant 0 : index
    %c0_2 = arith.constant 0 : index
    %1 = vector.load %arg1[%c0_1, %c0_2] : memref<2432x256xbf16, #tpu.memory_space<vmem>>, vector<128x256xbf16>
    %cst = arith.constant dense<0.000000e+00> : vector<8x256xf32>
    %2 = tpu.matmul %0, %1, %cst {dimension_numbers = #tpu.dot_dimension_numbers<[1], [0], [0], [1], [0, 0, 1, 1], [], []>} : vector<8x128xbf16>, vector<128x256xbf16>, vector<8x256xf32> -> vector<8x256xf32>
    %c0_3 = arith.constant 0 : index
    %c128 = arith.constant 128 : index
    %3 = vector.load %arg0[%c0_3, %c128] : memref<8x1920xbf16, #tpu.memory_space<vmem>>, vector<8x128xbf16>
    %c128_4 = arith.constant 128 : index
    %c0_5 = arith.constant 0 : index
    %4 = vector.load %arg1[%c128_4, %c0_5] : memref<2432x256xbf16, #tpu.memory_space<vmem>>, vector<128x256xbf16>
    %cst_6 = arith.constant dense<0.000000e+00> : vector<8x256xf32>
    %5 = tpu.matmul %3, %4, %cst_6 {dimension_numbers = #tpu.dot_dimension_numbers<[1], [0], [0], [1], [0, 0, 1, 1], [], []>} : vector<8x128xbf16>, vector<128x256xbf16>, vector<8x256xf32> -> vector<8x256xf32>
    %c0_7 = arith.constant 0 : index
    %c256 = arith.constant 256 : index
    %6 = vector.load %arg0[%c0_7, %c256] : memref<8x1920xbf16, #tpu.memory_space<vmem>>, vector<8x128xbf16>
    %c256_8 = arith.constant 256 : index
    %c0_9 = arith.constant 0 : index
    %7 = vector.load %arg1[%c256_8, %c0_9] : memref<2432x256xbf16, #tpu.memory_space<vmem>>, vector<128x256xbf16>
    %cst_10 = arith.constant dense<0.000000e+00> : vector<8x256xf32>
    %8 = tpu.matmul %6, %7, %cst_10 {dimension_numbers = #tpu.dot_dimension_numbers<[1], [0], [0], [1], [0, 0, 1, 1], [], []>} : vector<8x128xbf16>, vector<128x256xbf16>, vector<8x256xf32> -> vector<8x256xf32>
    %c0_11 = arith.constant 0 : index
    %c384 = arith.constant 384 : index
    %9 = vector.load %arg0[%c0_11, %c384] : memref<8x1920xbf16, #tpu.memory_space<vmem>>, vector<8x768xbf16>
    %c384_12 = arith.constant 384 : index
    %c0_13 = arith.constant 0 : index
    %10 = vector.load %arg1[%c384_12, %c0_13] : memref<2432x256xbf16, #tpu.memory_space<vmem>>, vector<768x256xbf16>
    %cst_14 = arith.constant dense<0.000000e+00> : vector<8x256xf32>
    %11 = tpu.matmul %9, %10, %cst_14 {dimension_numbers = #tpu.dot_dimension_numbers<[1], [0], [0], [1], [0, 0, 1, 1], [], []>} : vector<8x768xbf16>, vector<768x256xbf16>, vector<8x256xf32> -> vector<8x256xf32>
    %c0_15 = arith.constant 0 : index
    %c1152 = arith.constant 1152 : index
    %12 = vector.load %arg0[%c0_15, %c1152] : memref<8x1920xbf16, #tpu.memory_space<vmem>>, vector<8x768xbf16>
    %c1152_16 = arith.constant 1152 : index
    %c0_17 = arith.constant 0 : index
    %13 = vector.load %arg1[%c1152_16, %c0_17] : memref<2432x256xbf16, #tpu.memory_space<vmem>>, vector<768x256xbf16>
    %cst_18 = arith.constant dense<0.000000e+00> : vector<8x256xf32>
    %14 = tpu.matmul %12, %13, %cst_18 {dimension_numbers = #tpu.dot_dimension_numbers<[1], [0], [0], [1], [0, 0, 1, 1], [], []>} : vector<8x768xbf16>, vector<768x256xbf16>, vector<8x256xf32> -> vector<8x256xf32>
    %15 = tpu.concatenate %2, %5, %8, %11, %14 in 0 : vector<8x256xf32>, vector<8x256xf32>, vector<8x256xf32>, vector<8x256xf32>, vector<8x256xf32> -> vector<40x256xf32>
    %16 = arith.truncf %15 : vector<40x256xf32> to vector<40x256xbf16>
    %c0_19 = arith.constant 0 : index
    %c0_20 = arith.constant 0 : index
    %17 = vector.load %arg2[%c0_19, %c0_20] : memref<40x40xbf16, #tpu.memory_space<vmem>>, vector<40x40xbf16>
    %cst_21 = arith.constant dense<0.000000e+00> : vector<40x256xf32>
    %18 = tpu.matmul %17, %16, %cst_21 {dimension_numbers = #tpu.dot_dimension_numbers<[1], [0], [0], [1], [0, 0, 1, 1], [], []>} : vector<40x40xbf16>, vector<40x256xbf16>, vector<40x256xf32> -> vector<40x256xf32>
    %c0_22 = arith.constant 0 : index
    %c0_23 = arith.constant 0 : index
    %19 = vector.load %arg3[%c0_22, %c0_23] : memref<121x256xf32, #tpu.memory_space<vmem>>, vector<40x256xf32>
    %20 = arith.mulf %18, %19 : vector<40x256xf32>
    %c40 = arith.constant 40 : index
    %c0_24 = arith.constant 0 : index
    %21 = vector.load %arg3[%c40, %c0_24] : memref<121x256xf32, #tpu.memory_space<vmem>>, vector<40x256xf32>
    %22 = arith.addf %20, %21 : vector<40x256xf32>
    %23 = arith.truncf %22 : vector<40x256xf32> to vector<40x256xbf16>
    %c1920 = arith.constant 1920 : index
    %c0_25 = arith.constant 0 : index
    %24 = vector.load %arg1[%c1920, %c0_25] : memref<2432x256xbf16, #tpu.memory_space<vmem>>, vector<256x256xbf16>
    %cst_26 = arith.constant dense<0.000000e+00> : vector<40x256xf32>
    %25 = tpu.matmul %23, %24, %cst_26 {dimension_numbers = #tpu.dot_dimension_numbers<[1], [0], [0], [1], [0, 0, 1, 1], [], []>} : vector<40x256xbf16>, vector<256x256xbf16>, vector<40x256xf32> -> vector<40x256xf32>
    %c80 = arith.constant 80 : index
    %c0_27 = arith.constant 0 : index
    %26 = vector.load %arg3[%c80, %c0_27] : memref<121x256xf32, #tpu.memory_space<vmem>>, vector<40x256xf32>
    %27 = arith.mulf %25, %26 : vector<40x256xf32>
    %cst_28 = arith.constant dense<0.000000e+00> : vector<256xf32>
    %28 = vector.multi_reduction <add>, %27, %cst_28 [0] : vector<40x256xf32> to vector<256xf32>
    %29 = vector.shape_cast %28 : vector<256xf32> to vector<1x256xf32>
    %30 = arith.truncf %29 : vector<1x256xf32> to vector<1x256xbf16>
    %c2176 = arith.constant 2176 : index
    %c0_29 = arith.constant 0 : index
    %31 = vector.load %arg1[%c2176, %c0_29] : memref<2432x256xbf16, #tpu.memory_space<vmem>>, vector<256x256xbf16>
    %cst_30 = arith.constant dense<0.000000e+00> : vector<1x256xf32>
    %32 = tpu.matmul %30, %31, %cst_30 {dimension_numbers = #tpu.dot_dimension_numbers<[1], [0], [0], [1], [0, 0, 1, 1], [], []>} : vector<1x256xbf16>, vector<256x256xbf16>, vector<1x256xf32> -> vector<1x256xf32>
    %c120 = arith.constant 120 : index
    %c0_31 = arith.constant 0 : index
    %33 = vector.load %arg3[%c120, %c0_31] : memref<121x256xf32, #tpu.memory_space<vmem>>, vector<1x256xf32>
    %34 = arith.addf %32, %33 : vector<1x256xf32>
    %c0_32 = arith.constant 0 : index
    %c0_33 = arith.constant 0 : index
    %35 = vector.load %arg4[%c0_32, %c0_33] : memref<1x256xf32, #tpu.memory_space<vmem>>, vector<1x256xf32>
    tpu.vector_store %arg4[%c0_32, %c0_33], %34 {strides = array<i32>} : memref<1x256xf32, #tpu.memory_space<vmem>>, vector<1x256xf32>,
    return
  }
}

</mosaic_0001>

<bundles_post_ra>
// kernel: tpu_custom_call.1
= control target key start
LH: loop header
LB: loop body
LE: loop exit
PB: predicated region body
PF: predicated region fallthrough
CT: control target
= control target key end

     0   :  { %9 = vsyncpa [#allocation3], 0  ;;  %s3745_s0 = inlined_call_operand.hbm [shape: bf16[8,1920], index: 0, kind: input, shape index: {}]   ;;  %s3746_s1 = inlined_call_operand.hbm [shape: bf16[2432,256], index: 1, kind: input, shape index: {}]   ;;  %s3747_s2 = inlined_call_operand.hbm [shape: bf16[40,40], index: 2, kind: input, shape index: {}]   ;;  %s3748_s3 = inlined_call_operand.hbm [shape: f32[121,256], index: 3, kind: input, shape index: {}]   ;;  %s3749_s4 = inlined_call_operand.hbm [shape: f32[1,256], index: 4, kind: output, shape index: {}]  }
   0x1   :  { %10 = vsyncpa [#allocation6], 0 }
   0x2   :  { %11 = vsyncpa [#allocation9], 0 }
   0x3   :  { %12 = vsyncpa [#allocation4], 0  ;;  %s3602_s15 = smov [#allocation5]   ;;  %s3484_s19 = scalar_lea.hbm %s3746_s1, 38912 }
   0x4   :  { %s28_s16 = sshll.u32 %s3602_s15, 4  ;;  %p3485_p0 = scmp.ne.s32.totalorder %s3746_s1, %s3484_s19  ;;  %s29_s16 = int_to_ptr.vmem [resolvable:$true] %s28_s16 }
   0x5   :  { %p3488_p1 = scmp.lt.u32.totalorder %s3484_s19, %s3746_s1 }
   0x7   :  { %p3490_p2 = pnand %p3488_p1, %p3485_p0 }
   0x9   :  { %3493 = shalt.err (!%p3490_p2)
}
   0xa   :  { %s3494_s24 = scalar_lea.vmem %s29_s16, 38912  ;;  %p3499_p4 = scmp.lt.s32.totalorder %s29_s16, %s29_s16 }
   0xb   :  { %p3495_p3 = scmp.ne.s32.totalorder %s29_s16, %s3494_s24  ;;  %p3500_p5 = scmp.lt.s32.totalorder %s3494_s24, %s3494_s24 }
   0xd   :  { %p3501_p6 = por %p3500_p5, %p3499_p4 }
   0xf   :  { %p3502_p7 = pnand %p3501_p6, %p3495_p3 }
  0x11   :  { %3505 = shalt.err (!%p3502_p7)
}
  0x12   :  { %s3603_s25 = smov 128   ;;  %s3604_s26 = smov 8  }
  0x13   :  { %34 = dma.hbm_to_vmem [thread:$0]  %s3746_s1, 38912, %s29_s16, [#allocation6], %s3603_s25, %s3603_s25, %s3604_s26  }
  0x14   :  { %s3605_s29 = smov [#allocation2]   ;;  %s3606_s5 = smov [#allocation7]  }
  0x15   :  { %s19_s30 = sshll.u32 %s3605_s29, 4  ;;  %s40_s6 = sshll.u32 %s3606_s5, 4  ;;  %s20_s30 = int_to_ptr.vmem [resolvable:$true] %s19_s30  ;;  %s41_s6 = int_to_ptr.vmem [resolvable:$true] %s40_s6 }
  0x16   :  { %s3506_s9 = scalar_lea.hbm %s3745_s0, 960 }
  0x17   :  { %p3507_p8 = scmp.ne.s32.totalorder %s3745_s0, %s3506_s9  ;;  %p3510_p9 = scmp.lt.u32.totalorder %s3506_s9, %s3745_s0 }
  0x19   :  { %p3512_p10 = pnand %p3510_p9, %p3507_p8 }
  0x1b   :  { %3515 = shalt.err (!%p3512_p10)
}
  0x1c   :  { %s3516_s1 = scalar_lea.vmem %s20_s30, 960  ;;  %p3521_p12 = scmp.lt.s32.totalorder %s20_s30, %s20_s30 }
  0x1d   :  { %p3517_p11 = scmp.ne.s32.totalorder %s20_s30, %s3516_s1  ;;  %p3522_p13 = scmp.lt.s32.totalorder %s3516_s1, %s3516_s1 }
  0x1f   :  { %p3523_p0 = por %p3522_p13, %p3521_p12 }
  0x21   :  { %p3524_p1 = pnand %p3523_p0, %p3517_p11 }
  0x23   :  { %3527 = shalt.err (!%p3524_p1)
}
  0x24   :  { %22 = dma.hbm_to_vmem [thread:$0]  %s3745_s0, 960, %s20_s30, [#allocation3]  }
  0x25   :  { %s3528_s18 = scalar_lea.hbm %s3747_s2, 320 }
  0x26   :  { %p3529_p2 = scmp.ne.s32.totalorder %s3747_s2, %s3528_s18  ;;  %p3532_p3 = scmp.lt.u32.totalorder %s3528_s18, %s3747_s2 }
  0x28   :  { %p3534_p4 = pnand %p3532_p3, %p3529_p2 }
  0x2a   :  { %3537 = shalt.err (!%p3534_p4)
}
  0x2b   :  { %s3538_s23 = scalar_lea.vmem %s41_s6, 320  ;;  %p3543_p6 = scmp.lt.s32.totalorder %s41_s6, %s41_s6 }
  0x2c   :  { %p3539_p5 = scmp.ne.s32.totalorder %s41_s6, %s3538_s23  ;;  %p3544_p7 = scmp.lt.s32.totalorder %s3538_s23, %s3538_s23 }
  0x2e   :  { %p3545_p8 = por %p3544_p7, %p3543_p6 }
  0x30   :  { %p3546_p9 = pnand %p3545_p8, %p3539_p5 }
  0x32   :  { %3549 = shalt.err (!%p3546_p9)
}
  0x33   :  { %s3607_s0 = smov 64   ;;  %s3608_s24 = smov 4  }
  0x34   :  { %46 = dma.hbm_to_vmem [thread:$0]  %s3747_s2, 320, %s41_s6, [#allocation6], %s3607_s0, %s3607_s0, %s3608_s24  }
  0x35   :  { %s3609_s27 = smov [#allocation8]   ;;  %s3550_s5 = scalar_lea.hbm %s3748_s3, 4096 }
  0x36   :  { %s52_s28 = sshll.u32 %s3609_s27, 4  ;;  %p3551_p10 = scmp.ne.s32.totalorder %s3748_s3, %s3550_s5  ;;  %s53_s28 = int_to_ptr.vmem [resolvable:$true] %s52_s28 }
  0x37   :  { %p3554_p11 = scmp.lt.u32.totalorder %s3550_s5, %s3748_s3 }
  0x39   :  { %p3556_p12 = pnand %p3554_p11, %p3551_p10 }
  0x3b   :  { %3559 = shalt.err (!%p3556_p12)
}
  0x3c   :  { %s3560_s11 = scalar_lea.vmem %s53_s28, 4096  ;;  %p3565_p0 = scmp.lt.s32.totalorder %s53_s28, %s53_s28 }
  0x3d   :  { %p3561_p13 = scmp.ne.s32.totalorder %s53_s28, %s3560_s11  ;;  %p3566_p1 = scmp.lt.s32.totalorder %s3560_s11, %s3560_s11 }
  0x3f   :  { %p3567_p2 = por %p3566_p1, %p3565_p0 }
  0x41   :  { %p3568_p3 = pnand %p3567_p2, %p3561_p13 }
  0x43   :  { %3571 = shalt.err (!%p3568_p3)
}
  0x44   :  { %s3610_s2 = smov 256   ;;  %s3611_s6 = smov 16  }
  0x45   :  { %58 = dma.hbm_to_vmem [thread:$0]  %s3748_s3, 4096, %s53_s28, [#allocation9], %s3610_s2, %s3610_s2, %s3611_s6  }
  0x46   :  { %3594 = dma.done.wait [#allocation3], 960  }
  0x47   :  { %3595 = vsyncadd [#allocation3], 4294966336 }
  0x48   :  { %3596 = dma.done.wait [#allocation6], 39232  }
  0x49   :  { %3597 = vsyncadd [#allocation6], 4294928064 }
  0x4a   :  { %3598 = dma.done.wait [#allocation9], 4096  }
  0x4b   :  { %3599 = vsyncadd [#allocation9], 4294963200  ;;  %v3612_v0 = vmov 0   ;;  %v3013_v1 = vld [vmem:[#allocation5 + $0x4] ss:$8 sps:$4 sm:$0xff]   ;;  %vm1966_vm0 = vcmask 1043456  }
  0x4c   :  { %201 = vmatprep.mubr.bf16.mxu0 %v3612_v0  ;;  %339 = vmatprep.mubr.bf16.mxu1 %v3612_v0  ;;  %v3015_v2 = vld [vmem:[#allocation5 + $0x84] ss:$8 sps:$4 sm:$0xff]   ;;  %v3017_v3 = vld [vmem:[#allocation5] ss:$8 sps:$4 sm:$0xff]   ;;  %v3019_v5 = vld [vmem:[#allocation5 + $0x14] ss:$8 sps:$4 sm:$0xff]  }
  0x4d   :  { %169 = vmatprep.subr.bf16.mxu0 %v3013_v1  ;;  %v3018_v4 = vld [vmem:[#allocation5 + $0x80] ss:$8 sps:$4 sm:$0xff]   ;;  %307 = vmatprep.subr.bf16.mxu1 %v3015_v2  ;;  %v3021_v6 = vld [vmem:[#allocation5 + $0x94] ss:$8 sps:$4 sm:$0xff]   ;;  %v3023_v7 = vld [vmem:[#allocation5 + $0x10] ss:$8 sps:$4 sm:$0xff]  }
  0x4e   :  { %170 = vmatpush1.bf16.msra.mxu0 %v3017_v3  ;;  %308 = vmatpush1.bf16.msra.mxu1 %v3018_v4  ;;  %v3024_v8 = vld [vmem:[#allocation5 + $0x90] ss:$8 sps:$4 sm:$0xff]   ;;  %v3025_v9 = vld [vmem:[#allocation5 + $0x24] ss:$8 sps:$4 sm:$0xff]   ;;  %v3029_v11 = vld [vmem:[#allocation5 + $0x20] ss:$8 sps:$4 sm:$0xff]  }
  0x4f   :  { %171 = vmatprep.subr.bf16.mxu0 %v3019_v5  ;;  %309 = vmatprep.subr.bf16.mxu1 %v3021_v6  ;;  %v3027_v10 = vld [vmem:[#allocation5 + $0xa4] ss:$8 sps:$4 sm:$0xff]   ;;  %v3030_v12 = vld [vmem:[#allocation5 + $0xa0] ss:$8 sps:$4 sm:$0xff]   ;;  %v3031_v13 = vld [vmem:[#allocation5 + $0x34] ss:$8 sps:$4 sm:$0xff]  }
  0x50   :  { %v3033_v14 = vld [vmem:[#allocation5 + $0xb4] ss:$8 sps:$4 sm:$0xff]   ;;  %v3035_v15 = vld [vmem:[#allocation5 + $0x30] ss:$8 sps:$4 sm:$0xff]   ;;  %v3037_v17 = vld [vmem:[#allocation5 + $0x44] ss:$8 sps:$4 sm:$0xff]  }
  0x51   :  { %v3036_v16 = vld [vmem:[#allocation5 + $0xb0] ss:$8 sps:$4 sm:$0xff]   ;;  %v3039_v18 = vld [vmem:[#allocation5 + $0xc4] ss:$8 sps:$4 sm:$0xff]   ;;  %v3041_v19 = vld [vmem:[#allocation5 + $0x40] ss:$8 sps:$4 sm:$0xff]  }
  0x52   :  { %172 = vmatpush1.bf16.msra.mxu0 %v3023_v7  ;;  %310 = vmatpush1.bf16.msra.mxu1 %v3024_v8  ;;  %v3042_v20 = vld [vmem:[#allocation5 + $0xc0] ss:$8 sps:$4 sm:$0xff]   ;;  %v3043_v21 = vld [vmem:[#allocation5 + $0x54] ss:$8 sps:$4 sm:$0xff]   ;;  %v3047_v23 = vld [vmem:[#allocation5 + $0x50] ss:$8 sps:$4 sm:$0xff]  }
  0x53   :  { %173 = vmatprep.subr.bf16.mxu0 %v3025_v9  ;;  %311 = vmatprep.subr.bf16.mxu1 %v3027_v10  ;;  %v3045_v22 = vld [vmem:[#allocation5 + $0xd4] ss:$8 sps:$4 sm:$0xff]   ;;  %v3048_v24 = vld [vmem:[#allocation5 + $0xd0] ss:$8 sps:$4 sm:$0xff]   ;;  %v3049_v25 = vld [vmem:[#allocation5 + $0x64] ss:$8 sps:$4 sm:$0xff]  }
  0x54   :  { %v3051_v26 = vld [vmem:[#allocation5 + $0xe4] ss:$8 sps:$4 sm:$0xff]   ;;  %v3053_v27 = vld [vmem:[#allocation5 + $0x60] ss:$8 sps:$4 sm:$0xff]   ;;  %v3055_v29 = vld [vmem:[#allocation5 + $0x74] ss:$8 sps:$4 sm:$0xff]  }
  0x55   :  { %v3054_v28 = vld [vmem:[#allocation5 + $0xe0] ss:$8 sps:$4 sm:$0xff]   ;;  %v3057_v30 = vld [vmem:[#allocation5 + $0xf4] ss:$8 sps:$4 sm:$0xff]   ;;  %v3059_v31 = vld [vmem:[#allocation5 + $0x70] ss:$8 sps:$4 sm:$0xff]  }
  0x56   :  { %174 = vmatpush1.bf16.msra.mxu0 %v3029_v11  ;;  %312 = vmatpush1.bf16.msra.mxu1 %v3030_v12  ;;  %v3060_v32 = vld [vmem:[#allocation5 + $0xf0] ss:$8 sps:$4 sm:$0xff]   ;;  %v3063_v33 = vld [vmem:[#allocation5 + $0x104] ss:$8 sps:$4 sm:$0xff]   ;;  %v210_v36 = vld [vmem:[#allocation2 + $0x4] sm:$0xf] }
  0x57   :  { %175 = vmatprep.subr.bf16.mxu0 %v3031_v13  ;;  %313 = vmatprep.subr.bf16.mxu1 %v3033_v14  ;;  %v3066_v34 = vld [vmem:[#allocation5 + $0x184] ss:$8 sps:$4 sm:$0xff]   ;;  %v3061_v37 = vld [vmem:[#allocation5 + $0x100] ss:$8 sps:$4 sm:$0xff]   ;;  %v3069_v39 = vld [vmem:[#allocation5 + $0x114] ss:$8 sps:$4 sm:$0xff]  }
  0x58   :  { %v72_v35 = vld [vmem:[#allocation2] sm:$0xf]  ;;  %v3064_v38 = vld [vmem:[#allocation5 + $0x180] ss:$8 sps:$4 sm:$0xff]   ;;  %v3072_v40 = vld [vmem:[#allocation5 + $0x194] ss:$8 sps:$4 sm:$0xff]  }
  0x59   :  { %v3067_v41 = vld [vmem:[#allocation5 + $0x110] ss:$8 sps:$4 sm:$0xff]   ;;  %v3075_v43 = vld [vmem:[#allocation5 + $0x124] ss:$8 sps:$4 sm:$0xff]   ;;  %v3073_v45 = vld [vmem:[#allocation5 + $0x120] ss:$8 sps:$4 sm:$0xff]  }
  0x5a   :  { %176 = vmatpush1.bf16.msra.mxu0 %v3035_v15  ;;  %314 = vmatpush1.bf16.msra.mxu1 %v3036_v16  ;;  %v3070_v42 = vld [vmem:[#allocation5 + $0x190] ss:$8 sps:$4 sm:$0xff]   ;;  %v3078_v44 = vld [vmem:[#allocation5 + $0x1a4] ss:$8 sps:$4 sm:$0xff]   ;;  %v3076_v46 = vld [vmem:[#allocation5 + $0x1a0] ss:$8 sps:$4 sm:$0xff]  }
  0x5b   :  { %177 = vmatprep.subr.bf16.mxu0 %v3037_v17  ;;  %315 = vmatprep.subr.bf16.mxu1 %v3039_v18  ;;  %v3081_v47 = vld [vmem:[#allocation5 + $0x134] ss:$8 sps:$4 sm:$0xff]   ;;  %v3079_v49 = vld [vmem:[#allocation5 + $0x130] ss:$8 sps:$4 sm:$0xff]   ;;  %v3087_v51 = vld [vmem:[#allocation5 + $0x144] ss:$8 sps:$4 sm:$0xff]  }
  0x5c   :  { %v3084_v48 = vld [vmem:[#allocation5 + $0x1b4] ss:$8 sps:$4 sm:$0xff]   ;;  %v3082_v50 = vld [vmem:[#allocation5 + $0x1b0] ss:$8 sps:$4 sm:$0xff]   ;;  %v3090_v52 = vld [vmem:[#allocation5 + $0x1c4] ss:$8 sps:$4 sm:$0xff]  }
  0x5d   :  { %v3085_v53 = vld [vmem:[#allocation5 + $0x140] ss:$8 sps:$4 sm:$0xff]   ;;  %v3093_v55 = vld [vmem:[#allocation5 + $0x154] ss:$8 sps:$4 sm:$0xff]   ;;  %v3091_v57 = vld [vmem:[#allocation5 + $0x150] ss:$8 sps:$4 sm:$0xff]  }
  0x5e   :  { %178 = vmatpush1.bf16.msra.mxu0 %v3041_v19  ;;  %316 = vmatpush1.bf16.msra.mxu1 %v3042_v20  ;;  %v3088_v54 = vld [vmem:[#allocation5 + $0x1c0] ss:$8 sps:$4 sm:$0xff]   ;;  %v3096_v56 = vld [vmem:[#allocation5 + $0x1d4] ss:$8 sps:$4 sm:$0xff]   ;;  %v3094_v58 = vld [vmem:[#allocation5 + $0x1d0] ss:$8 sps:$4 sm:$0xff]  }
  0x5f   :  { %179 = vmatprep.subr.bf16.mxu0 %v3043_v21  ;;  %317 = vmatprep.subr.bf16.mxu1 %v3045_v22  ;;  %v3099_v59 = vld [vmem:[#allocation5 + $0x164] ss:$8 sps:$4 sm:$0xff]   ;;  %v3097_v61 = vld [vmem:[#allocation5 + $0x160] ss:$8 sps:$4 sm:$0xff]   ;;  %v3105_v63 = vld [vmem:[#allocation5 + $0x174] ss:$8 sps:$4 sm:$0xff]  }
  0x60   :  { %v3102_v60 = vld [vmem:[#allocation5 + $0x1e4] ss:$8 sps:$4 sm:$0xff]   ;;  %v3100_v62 = vld [vmem:[#allocation5 + $0x1e0] ss:$8 sps:$4 sm:$0xff]   ;;  %v3108_v1 = vld [vmem:[#allocation5 + $0x1f4] ss:$8 sps:$4 sm:$0xff]  }
  0x61   :  { %v3103_v2 = vld [vmem:[#allocation5 + $0x170] ss:$8 sps:$4 sm:$0xff]   ;;  %v3111_v4 = vld [vmem:[#allocation5 + $0x204] ss:$8 sps:$4 sm:$0xff]   ;;  %v3109_v7 = vld [vmem:[#allocation5 + $0x200] ss:$8 sps:$4 sm:$0xff]  }
  0x62   :  { %180 = vmatpush1.bf16.msra.mxu0 %v3047_v23  ;;  %318 = vmatpush1.bf16.msra.mxu1 %v3048_v24  ;;  %v3106_v3 = vld [vmem:[#allocation5 + $0x1f0] ss:$8 sps:$4 sm:$0xff]   ;;  %v3114_v5 = vld [vmem:[#allocation5 + $0x484] ss:$8 sps:$4 sm:$0xff]   ;;  %v3112_v8 = vld [vmem:[#allocation5 + $0x480] ss:$8 sps:$4 sm:$0xff]  }
  0x63   :  { %181 = vmatprep.subr.bf16.mxu0 %v3049_v25  ;;  %319 = vmatprep.subr.bf16.mxu1 %v3051_v26  ;;  %v348_v6 = vld [vmem:[#allocation2 + $0x8] sm:$0xf]  ;;  %v3117_v9 = vld [vmem:[#allocation5 + $0x214] ss:$8 sps:$4 sm:$0xff]   ;;  %v3115_v13 = vld [vmem:[#allocation5 + $0x210] ss:$8 sps:$4 sm:$0xff]  }
  0x64   :  { %v3120_v10 = vld [vmem:[#allocation5 + $0x494] ss:$8 sps:$4 sm:$0xff]   ;;  %v3118_v14 = vld [vmem:[#allocation5 + $0x490] ss:$8 sps:$4 sm:$0xff]   ;;  %v3123_v15 = vld [vmem:[#allocation5 + $0x224] ss:$8 sps:$4 sm:$0xff]  }
  0x65   :  { %v3691_v11 = vld [vmem:[#allocation2 + $0xc] sm:$0xff]  ;;  %v3126_v16 = vld [vmem:[#allocation5 + $0x4a4] ss:$8 sps:$4 sm:$0xff]   ;;  %v3121_v17 = vld [vmem:[#allocation5 + $0x220] ss:$8 sps:$4 sm:$0xff]   ;;  %vm1956_vm1 = vcmask 326656  }
  0x66   :  { %182 = vmatpush1.bf16.msra.mxu0 %v3053_v27  ;;  %320 = vmatpush1.bf16.msra.mxu1 %v3054_v28  ;;  %v2710_v12 = vcombine.high %v3691_v11, %v3691_v11  ;;  %v3124_v18 = vld [vmem:[#allocation5 + $0x4a0] ss:$8 sps:$4 sm:$0xff]   ;;  %v3129_v19 = vld [vmem:[#allocation5 + $0x234] ss:$8 sps:$4 sm:$0xff]   ;;  %v3127_v21 = vld [vmem:[#allocation5 + $0x230] ss:$8 sps:$4 sm:$0xff]  }
  0x67   :  { %183 = vmatprep.subr.bf16.mxu0 %v3055_v29  ;;  %321 = vmatprep.subr.bf16.mxu1 %v3057_v30  ;;  %v3132_v20 = vld [vmem:[#allocation5 + $0x4b4] ss:$8 sps:$4 sm:$0xff]   ;;  %v3130_v22 = vld [vmem:[#allocation5 + $0x4b0] ss:$8 sps:$4 sm:$0xff]   ;;  %v3135_v23 = vld [vmem:[#allocation5 + $0x244] ss:$8 sps:$4 sm:$0xff]  }
  0x68   :  { %v3138_v24 = vld [vmem:[#allocation5 + $0x4c4] ss:$8 sps:$4 sm:$0xff]   ;;  %v3133_v25 = vld [vmem:[#allocation5 + $0x240] ss:$8 sps:$4 sm:$0xff]   ;;  %v3141_v27 = vld [vmem:[#allocation5 + $0x254] ss:$8 sps:$4 sm:$0xff]  }
  0x69   :  { %v3136_v26 = vld [vmem:[#allocation5 + $0x4c0] ss:$8 sps:$4 sm:$0xff]   ;;  %v3144_v28 = vld [vmem:[#allocation5 + $0x4d4] ss:$8 sps:$4 sm:$0xff]   ;;  %v3139_v29 = vld [vmem:[#allocation5 + $0x250] ss:$8 sps:$4 sm:$0xff]  }
  0x6a   :  { %184 = vmatpush1.bf16.msra.mxu0 %v3059_v31  ;;  %322 = vmatpush1.bf16.msra.mxu1 %v3060_v32  ;;  %v3142_v30 = vld [vmem:[#allocation5 + $0x4d0] ss:$8 sps:$4 sm:$0xff]   ;;  %v3147_v31 = vld [vmem:[#allocation5 + $0x264] ss:$8 sps:$4 sm:$0xff]   ;;  %s3614_s3 = smov [#allocation10]  }
  0x6b   :  { %445 = vmatprep.subr.bf16.mxu0 %v3063_v33  ;;  %1086 = vmatprep.subr.bf16.mxu1 %v3066_v34  ;;  %v3150_v32 = vld [vmem:[#allocation5 + $0x4e4] ss:$8 sps:$4 sm:$0xff]   ;;  %v3145_v33 = vld [vmem:[#allocation5 + $0x260] ss:$8 sps:$4 sm:$0xff]   ;;  %s2650_s1 = sshll.u32 %s3614_s3, 4  ;;  %s2651_s1 = int_to_ptr.vmem [resolvable:$true] %s2650_s1 }
  0x6c   :  { %v3148_v34 = vld [vmem:[#allocation5 + $0x4e0] ss:$8 sps:$4 sm:$0xff]   ;;  %s3572_s14 = scalar_lea.vmem %s2651_s1, 32  ;;  %p3577_p5 = scmp.lt.s32.totalorder %s2651_s1, %s2651_s1 }
  0x6d   :  { %202 = vmatmul.mubr.bf16.vlgmr.msra.gmra.mrb[0].mxu0 %v72_v35  ;;  %340 = vmatmul.mubr.bf16.vlgmr.msra.gmra.mrb[0].mxu1 %v210_v36  ;;  %v3695_v35 = vld [vmem:[#allocation2 + $0x24] sm:$0xff]  ;;  %v3153_v36 = vld [vmem:[#allocation5 + $0x274] ss:$8 sps:$4 sm:$0xff]   ;;  %p3573_p4 = scmp.ne.s32.totalorder %s2651_s1, %s3572_s14  ;;  %p3578_p6 = scmp.lt.s32.totalorder %s3572_s14, %s3572_s14 }
  0x6e   :  { %446 = vmatpush1.bf16.msra.mxu0 %v3061_v37  ;;  %1087 = vmatpush1.bf16.msra.mxu1 %v3064_v38  ;;  %v3156_v37 = vld [vmem:[#allocation5 + $0x4f4] ss:$8 sps:$4 sm:$0xff]   ;;  %v2812_v38 = vcombine.high %v3695_v35, %v3695_v35 }
  0x6f   :  { %447 = vmatprep.subr.bf16.mxu0 %v3069_v39  ;;  %1088 = vmatprep.subr.bf16.mxu1 %v3072_v40  ;;  %v3151_v39 = vld [vmem:[#allocation5 + $0x270] ss:$8 sps:$4 sm:$0xff]   ;;  %p3579_p7 = por %p3578_p6, %p3577_p5 }
  0x70   :  { %477 = vmatprep.mubr.bf16.mxu0 %v3612_v0  ;;  %1118 = vmatprep.mubr.bf16.mxu1 %v2710_v12  ;;  %v3154_v40 = vld [vmem:[#allocation5 + $0x4f0] ss:$8 sps:$4 sm:$0xff]  }
  0x71   :  { %v3204_v12 = vld [vmem:[#allocation5 + $0x570] ss:$8 sps:$4 sm:$0xff]   ;;  %p3580_p8 = pnand %p3579_p7, %p3573_p4 }
  0x72   :  { %448 = vmatpush1.bf16.msra.mxu0 %v3067_v41  ;;  %1089 = vmatpush1.bf16.msra.mxu1 %v3070_v42  ;;  %v3161_v41 = vld [vmem:[#allocation5 + $0x284] ss:$8 sps:$4 sm:$0xff]  }
  0x73   :  { %449 = vmatprep.subr.bf16.mxu0 %v3075_v43  ;;  %1090 = vmatprep.subr.bf16.mxu1 %v3078_v44  ;;  %v3164_v42 = vld [vmem:[#allocation5 + $0x504] ss:$8 sps:$4 sm:$0xff]   ;;  %v2709_v43 = vcombine.low %v3691_v11, %v3691_v11  ;;  %v3159_v44 = vld [vmem:[#allocation5 + $0x280] ss:$8 sps:$4 sm:$0xff]   ;;  %v3201_v11 = vld [vmem:[#allocation5 + $0x2f0] ss:$8 sps:$4 sm:$0xff]  }
  0x76   :  { %450 = vmatpush1.bf16.msra.mxu0 %v3073_v45  ;;  %1091 = vmatpush1.bf16.msra.mxu1 %v3076_v46  ;;  %v3162_v45 = vld [vmem:[#allocation5 + $0x500] ss:$8 sps:$4 sm:$0xff]   ;;  %v3167_v46 = vld [vmem:[#allocation5 + $0x294] ss:$8 sps:$4 sm:$0xff]  }
  0x77   :  { %451 = vmatprep.subr.bf16.mxu0 %v3081_v47  ;;  %1092 = vmatprep.subr.bf16.mxu1 %v3084_v48  ;;  %v3170_v47 = vld [vmem:[#allocation5 + $0x514] ss:$8 sps:$4 sm:$0xff]   ;;  %v3165_v48 = vld [vmem:[#allocation5 + $0x290] ss:$8 sps:$4 sm:$0xff]  }
  0x7a   :  { %452 = vmatpush1.bf16.msra.mxu0 %v3079_v49  ;;  %1093 = vmatpush1.bf16.msra.mxu1 %v3082_v50  ;;  %v3168_v49 = vld [vmem:[#allocation5 + $0x510] ss:$8 sps:$4 sm:$0xff]   ;;  %v3173_v50 = vld [vmem:[#allocation5 + $0x2a4] ss:$8 sps:$4 sm:$0xff]  }
  0x7b   :  { %453 = vmatprep.subr.bf16.mxu0 %v3087_v51  ;;  %1094 = vmatprep.subr.bf16.mxu1 %v3090_v52  ;;  %v3176_v51 = vld [vmem:[#allocation5 + $0x524] ss:$8 sps:$4 sm:$0xff]   ;;  %v3171_v52 = vld [vmem:[#allocation5 + $0x2a0] ss:$8 sps:$4 sm:$0xff]  }
  0x7e   :  { %454 = vmatpush1.bf16.msra.mxu0 %v3085_v53  ;;  %1095 = vmatpush1.bf16.msra.mxu1 %v3088_v54  ;;  %v3174_v53 = vld [vmem:[#allocation5 + $0x520] ss:$8 sps:$4 sm:$0xff]   ;;  %v3179_v54 = vld [vmem:[#allocation5 + $0x2b4] ss:$8 sps:$4 sm:$0xff]  }
  0x7f   :  { %455 = vmatprep.subr.bf16.mxu0 %v3093_v55  ;;  %1096 = vmatprep.subr.bf16.mxu1 %v3096_v56  ;;  %v3182_v55 = vld [vmem:[#allocation5 + $0x534] ss:$8 sps:$4 sm:$0xff]   ;;  %v3177_v56 = vld [vmem:[#allocation5 + $0x2b0] ss:$8 sps:$4 sm:$0xff]  }
  0x82   :  { %456 = vmatpush1.bf16.msra.mxu0 %v3091_v57  ;;  %1097 = vmatpush1.bf16.msra.mxu1 %v3094_v58  ;;  %v3180_v57 = vld [vmem:[#allocation5 + $0x530] ss:$8 sps:$4 sm:$0xff]  }
  0x83   :  { %457 = vmatprep.subr.bf16.mxu0 %v3099_v59  ;;  %1098 = vmatprep.subr.bf16.mxu1 %v3102_v60  ;;  %v3701_v58 = vld [vmem:[#allocation2 + $0x14] sm:$0xff]  ;;  %v3185_v59 = vld [vmem:[#allocation5 + $0x2c4] ss:$8 sps:$4 sm:$0xff]  }
  0x84   :  { %v3188_v60 = vld [vmem:[#allocation5 + $0x544] ss:$8 sps:$4 sm:$0xff]  }
  0x86   :  { %458 = vmatpush1.bf16.msra.mxu0 %v3097_v61  ;;  %1099 = vmatpush1.bf16.msra.mxu1 %v3100_v62  ;;  %v2712_v61 = vcombine.high %v3701_v58, %v3701_v58  ;;  %v3183_v62 = vld [vmem:[#allocation5 + $0x2c0] ss:$8 sps:$4 sm:$0xff]  }
  0x87   :  { %459 = vmatprep.subr.bf16.mxu0 %v3105_v63  ;;  %1100 = vmatprep.subr.bf16.mxu1 %v3108_v1  ;;  %v3186_v63 = vld [vmem:[#allocation5 + $0x540] ss:$8 sps:$4 sm:$0xff]   ;;  %v3191_v1 = vld [vmem:[#allocation5 + $0x2d4] ss:$8 sps:$4 sm:$0xff]  }
  0x8a   :  { %460 = vmatpush1.bf16.msra.mxu0 %v3103_v2  ;;  %1101 = vmatpush1.bf16.msra.mxu1 %v3106_v3  ;;  %v3194_v2 = vld [vmem:[#allocation5 + $0x554] ss:$8 sps:$4 sm:$0xff]   ;;  %v3189_v3 = vld [vmem:[#allocation5 + $0x2d0] ss:$8 sps:$4 sm:$0xff]  }
  0x8b   :  { %1102 = vmatprep.subr.bf16.mxu1 %v3111_v4  ;;  %1809 = vmatprep.subr.bf16.mxu0 %v3114_v5  ;;  %v3192_v4 = vld [vmem:[#allocation5 + $0x550] ss:$8 sps:$4 sm:$0xff]   ;;  %v3197_v5 = vld [vmem:[#allocation5 + $0x2e4] ss:$8 sps:$4 sm:$0xff]  }
  0x8d   :  { %478 = vmatmul.mubr.bf16.vlgmr.msra.gmra.mrb[4].mxu0 %v348_v6  ;;  %v3200_v6 = vld [vmem:[#allocation5 + $0x564] ss:$8 sps:$4 sm:$0xff]  }
  0x8e   :  { %1103 = vmatpush1.bf16.msra.mxu1 %v3109_v7  ;;  %1810 = vmatpush1.bf16.msra.mxu0 %v3112_v8  ;;  %v3195_v7 = vld [vmem:[#allocation5 + $0x2e0] ss:$8 sps:$4 sm:$0xff]  }
  0x8f   :  { %1104 = vmatprep.subr.bf16.mxu1 %v3117_v9  ;;  %1811 = vmatprep.subr.bf16.mxu0 %v3120_v10  ;;  %v3198_v8 = vld [vmem:[#allocation5 + $0x560] ss:$8 sps:$4 sm:$0xff]   ;;  %v3203_v9 = vld [vmem:[#allocation5 + $0x2f4] ss:$8 sps:$4 sm:$0xff]  }
  0x90   :  { %1841 = vmatprep.mubr.bf16.mxu0 %v2812_v38  ;;  %v3206_v10 = vld [vmem:[#allocation5 + $0x574] ss:$8 sps:$4 sm:$0xff]   ;;  %v3239_v38 = vld [vmem:[#allocation5 + $0x350] ss:$8 sps:$4 sm:$0xff]  }
  0x92   :  { %1105 = vmatpush1.bf16.msra.mxu1 %v3115_v13  ;;  %1812 = vmatpush1.bf16.msra.mxu0 %v3118_v14  ;;  %v3209_v13 = vld [vmem:[#allocation5 + $0x304] ss:$8 sps:$4 sm:$0xff]  }
  0x93   :  { %1106 = vmatprep.subr.bf16.mxu1 %v3123_v15  ;;  %1813 = vmatprep.subr.bf16.mxu0 %v3126_v16  ;;  %v3214_v14 = vld [vmem:[#allocation5 + $0x584] ss:$8 sps:$4 sm:$0xff]   ;;  %v2811_v15 = vcombine.low %v3695_v35, %v3695_v35  ;;  %v3207_v16 = vld [vmem:[#allocation5 + $0x300] ss:$8 sps:$4 sm:$0xff]  }
  0x94   :  { %v3236_v35 = vld [vmem:[#allocation5 + $0x5c0] ss:$8 sps:$4 sm:$0xff]  }
  0x96   :  { %1107 = vmatpush1.bf16.msra.mxu1 %v3121_v17  ;;  %1814 = vmatpush1.bf16.msra.mxu0 %v3124_v18  ;;  %v3212_v17 = vld [vmem:[#allocation5 + $0x580] ss:$8 sps:$4 sm:$0xff]   ;;  %v3217_v18 = vld [vmem:[#allocation5 + $0x314] ss:$8 sps:$4 sm:$0xff]  }
  0x97   :  { %1108 = vmatprep.subr.bf16.mxu1 %v3129_v19  ;;  %1815 = vmatprep.subr.bf16.mxu0 %v3132_v20  ;;  %v3220_v19 = vld [vmem:[#allocation5 + $0x594] ss:$8 sps:$4 sm:$0xff]   ;;  %v3215_v20 = vld [vmem:[#allocation5 + $0x310] ss:$8 sps:$4 sm:$0xff]  }
  0x9a   :  { %1109 = vmatpush1.bf16.msra.mxu1 %v3127_v21  ;;  %1816 = vmatpush1.bf16.msra.mxu0 %v3130_v22  ;;  %v3707_v21 = vld [vmem:[#allocation2 + $0x2c] sm:$0xff] }
  0x9b   :  { %1110 = vmatprep.subr.bf16.mxu1 %v3135_v23  ;;  %1817 = vmatprep.subr.bf16.mxu0 %v3138_v24  ;;  %v3218_v22 = vld [vmem:[#allocation5 + $0x590] ss:$8 sps:$4 sm:$0xff]   ;;  %v3223_v23 = vld [vmem:[#allocation5 + $0x324] ss:$8 sps:$4 sm:$0xff]   ;;  %v2814_v24 = vcombine.high %v3707_v21, %v3707_v21 }
  0x9e   :  { %1111 = vmatpush1.bf16.msra.mxu1 %v3133_v25  ;;  %1818 = vmatpush1.bf16.msra.mxu0 %v3136_v26  ;;  %v3226_v25 = vld [vmem:[#allocation5 + $0x5a4] ss:$8 sps:$4 sm:$0xff]   ;;  %v3221_v26 = vld [vmem:[#allocation5 + $0x320] ss:$8 sps:$4 sm:$0xff]  }
  0x9f   :  { %1112 = vmatprep.subr.bf16.mxu1 %v3141_v27  ;;  %1819 = vmatprep.subr.bf16.mxu0 %v3144_v28  ;;  %v3224_v27 = vld [vmem:[#allocation5 + $0x5a0] ss:$8 sps:$4 sm:$0xff]   ;;  %v3229_v28 = vld [vmem:[#allocation5 + $0x334] ss:$8 sps:$4 sm:$0xff]  }
  0xa2   :  { %1113 = vmatpush1.bf16.msra.mxu1 %v3139_v29  ;;  %1820 = vmatpush1.bf16.msra.mxu0 %v3142_v30  ;;  %v3232_v29 = vld [vmem:[#allocation5 + $0x5b4] ss:$8 sps:$4 sm:$0xff]   ;;  %v3227_v30 = vld [vmem:[#allocation5 + $0x330] ss:$8 sps:$4 sm:$0xff]  }
  0xa3   :  { %1114 = vmatprep.subr.bf16.mxu1 %v3147_v31  ;;  %1821 = vmatprep.subr.bf16.mxu0 %v3150_v32  ;;  %v3230_v31 = vld [vmem:[#allocation5 + $0x5b0] ss:$8 sps:$4 sm:$0xff]   ;;  %v3235_v32 = vld [vmem:[#allocation5 + $0x344] ss:$8 sps:$4 sm:$0xff]  }
  0xa6   :  { %1115 = vmatpush1.bf16.msra.mxu1 %v3145_v33  ;;  %1822 = vmatpush1.bf16.msra.mxu0 %v3148_v34  ;;  %v3238_v33 = vld [vmem:[#allocation5 + $0x5c4] ss:$8 sps:$4 sm:$0xff]   ;;  %v3233_v34 = vld [vmem:[#allocation5 + $0x340] ss:$8 sps:$4 sm:$0xff]  }
  0xa7   :  { %1116 = vmatprep.subr.bf16.mxu1 %v3153_v36  ;;  %1823 = vmatprep.subr.bf16.mxu0 %v3156_v37  ;;  %v3241_v36 = vld [vmem:[#allocation5 + $0x354] ss:$8 sps:$4 sm:$0xff]  }
  0xa8   :  { %v3244_v37 = vld [vmem:[#allocation5 + $0x5d4] ss:$8 sps:$4 sm:$0xff]  }
  0xaa   :  { %1117 = vmatpush1.bf16.msra.mxu1 %v3151_v39  ;;  %1824 = vmatpush1.bf16.msra.mxu0 %v3154_v40  ;;  %v3242_v39 = vld [vmem:[#allocation5 + $0x5d0] ss:$8 sps:$4 sm:$0xff]   ;;  %v3247_v40 = vld [vmem:[#allocation5 + $0x364] ss:$8 sps:$4 sm:$0xff]  }
  0xab   :  { %1127 = vmatprep.subr.bf16.mxu1 %v3161_v41  ;;  %1825 = vmatprep.subr.bf16.mxu0 %v3164_v42  ;;  %v3250_v41 = vld [vmem:[#allocation5 + $0x5e4] ss:$8 sps:$4 sm:$0xff]   ;;  %v3245_v42 = vld [vmem:[#allocation5 + $0x360] ss:$8 sps:$4 sm:$0xff]  }
  0xad   :  { %1119 = vmatmul.mubr.bf16.vlgmr.msra.gmra.mrb[4].mxu1 %v2709_v43  ;;  %v3248_v43 = vld [vmem:[#allocation5 + $0x5e0] ss:$8 sps:$4 sm:$0xff]  }
  0xae   :  { %1128 = vmatpush1.bf16.msra.mxu1 %v3159_v44  ;;  %1826 = vmatpush1.bf16.msra.mxu0 %v3162_v45  ;;  %v3253_v44 = vld [vmem:[#allocation5 + $0x374] ss:$8 sps:$4 sm:$0xff]  }
  0xaf   :  { %1129 = vmatprep.subr.bf16.mxu1 %v3167_v46  ;;  %1827 = vmatprep.subr.bf16.mxu0 %v3170_v47  ;;  %v3256_v45 = vld [vmem:[#allocation5 + $0x5f4] ss:$8 sps:$4 sm:$0xff]   ;;  %v3251_v46 = vld [vmem:[#allocation5 + $0x370] ss:$8 sps:$4 sm:$0xff]  }
  0xb0   :  { %1159 = vmatprep.mubr.bf16.mxu1 %v2712_v61  ;;  %v3254_v47 = vld [vmem:[#allocation5 + $0x5f0] ss:$8 sps:$4 sm:$0xff]   ;;  %v3276_v61 = vld [vmem:[#allocation5 + $0x624] ss:$8 sps:$4 sm:$0xff]  }
  0xb2   :  { %1130 = vmatpush1.bf16.msra.mxu1 %v3165_v48  ;;  %1828 = vmatpush1.bf16.msra.mxu0 %v3168_v49  ;;  %v3261_v48 = vld [vmem:[#allocation5 + $0x384] ss:$8 sps:$4 sm:$0xff]  }
  0xb3   :  { %1131 = vmatprep.subr.bf16.mxu1 %v3173_v50  ;;  %1829 = vmatprep.subr.bf16.mxu0 %v3176_v51  ;;  %v3264_v49 = vld [vmem:[#allocation5 + $0x604] ss:$8 sps:$4 sm:$0xff]   ;;  %v3259_v50 = vld [vmem:[#allocation5 + $0x380] ss:$8 sps:$4 sm:$0xff]   ;;  %v2711_v51 = vcombine.low %v3701_v58, %v3701_v58 }
  0xb4   :  { %v3271_v58 = vld [vmem:[#allocation5 + $0x3a0] ss:$8 sps:$4 sm:$0xff]  }
  0xb6   :  { %1132 = vmatpush1.bf16.msra.mxu1 %v3171_v52  ;;  %1830 = vmatpush1.bf16.msra.mxu0 %v3174_v53  ;;  %v3262_v52 = vld [vmem:[#allocation5 + $0x600] ss:$8 sps:$4 sm:$0xff]  }
  0xb7   :  { %1133 = vmatprep.subr.bf16.mxu1 %v3179_v54  ;;  %1831 = vmatprep.subr.bf16.mxu0 %v3182_v55  ;;  %v3713_v53 = vld [vmem:[#allocation2 + $0x1c] sm:$0xff]  ;;  %v3267_v54 = vld [vmem:[#allocation5 + $0x394] ss:$8 sps:$4 sm:$0xff]  }
  0xb8   :  { %v3270_v55 = vld [vmem:[#allocation5 + $0x614] ss:$8 sps:$4 sm:$0xff]  }
  0xba   :  { %1134 = vmatpush1.bf16.msra.mxu1 %v3177_v56  ;;  %1832 = vmatpush1.bf16.msra.mxu0 %v3180_v57  ;;  %v3265_v56 = vld [vmem:[#allocation5 + $0x390] ss:$8 sps:$4 sm:$0xff]  }
  0xbb   :  { %1135 = vmatprep.subr.bf16.mxu1 %v3185_v59  ;;  %1833 = vmatprep.subr.bf16.mxu0 %v3188_v60  ;;  %v3268_v57 = vld [vmem:[#allocation5 + $0x610] ss:$8 sps:$4 sm:$0xff]   ;;  %v2714_v59 = vcombine.high %v3713_v53, %v3713_v53  ;;  %v3273_v60 = vld [vmem:[#allocation5 + $0x3a4] ss:$8 sps:$4 sm:$0xff]  }
  0xbe   :  { %1136 = vmatpush1.bf16.msra.mxu1 %v3183_v62  ;;  %1834 = vmatpush1.bf16.msra.mxu0 %v3186_v63  ;;  %v3274_v62 = vld [vmem:[#allocation5 + $0x620] ss:$8 sps:$4 sm:$0xff]   ;;  %v3279_v63 = vld [vmem:[#allocation5 + $0x3b4] ss:$8 sps:$4 sm:$0xff]  }
  0xbf   :  { %1137 = vmatprep.subr.bf16.mxu1 %v3191_v1  ;;  %1835 = vmatprep.subr.bf16.mxu0 %v3194_v2  ;;  %v3282_v1 = vld [vmem:[#allocation5 + $0x634] ss:$8 sps:$4 sm:$0xff]   ;;  %v3277_v2 = vld [vmem:[#allocation5 + $0x3b0] ss:$8 sps:$4 sm:$0xff]  }
  0xc2   :  { %1138 = vmatpush1.bf16.msra.mxu1 %v3189_v3  ;;  %1836 = vmatpush1.bf16.msra.mxu0 %v3192_v4  ;;  %v3280_v3 = vld [vmem:[#allocation5 + $0x630] ss:$8 sps:$4 sm:$0xff]   ;;  %v3285_v4 = vld [vmem:[#allocation5 + $0x3c4] ss:$8 sps:$4 sm:$0xff]  }
  0xc3   :  { %1139 = vmatprep.subr.bf16.mxu1 %v3197_v5  ;;  %1837 = vmatprep.subr.bf16.mxu0 %v3200_v6  ;;  %v3288_v5 = vld [vmem:[#allocation5 + $0x644] ss:$8 sps:$4 sm:$0xff]   ;;  %v3283_v6 = vld [vmem:[#allocation5 + $0x3c0] ss:$8 sps:$4 sm:$0xff]  }
  0xc6   :  { %1140 = vmatpush1.bf16.msra.mxu1 %v3195_v7  ;;  %1838 = vmatpush1.bf16.msra.mxu0 %v3198_v8  ;;  %v3286_v7 = vld [vmem:[#allocation5 + $0x640] ss:$8 sps:$4 sm:$0xff]   ;;  %v3291_v8 = vld [vmem:[#allocation5 + $0x3d4] ss:$8 sps:$4 sm:$0xff]  }
  0xc7   :  { %1141 = vmatprep.subr.bf16.mxu1 %v3203_v9  ;;  %1839 = vmatprep.subr.bf16.mxu0 %v3206_v10  ;;  %v3294_v9 = vld [vmem:[#allocation5 + $0x654] ss:$8 sps:$4 sm:$0xff]   ;;  %v3289_v10 = vld [vmem:[#allocation5 + $0x3d0] ss:$8 sps:$4 sm:$0xff]  }
  0xca   :  { %1142 = vmatpush1.bf16.msra.mxu1 %v3201_v11  ;;  %1840 = vmatpush1.bf16.msra.mxu0 %v3204_v12  ;;  %v3292_v11 = vld [vmem:[#allocation5 + $0x650] ss:$8 sps:$4 sm:$0xff]   ;;  %v3297_v12 = vld [vmem:[#allocation5 + $0x3e4] ss:$8 sps:$4 sm:$0xff]  }
  0xcb   :  { %1143 = vmatprep.subr.bf16.mxu1 %v3209_v13  ;;  %1850 = vmatprep.subr.bf16.mxu0 %v3214_v14  ;;  %v3300_v13 = vld [vmem:[#allocation5 + $0x664] ss:$8 sps:$4 sm:$0xff]   ;;  %v3295_v14 = vld [vmem:[#allocation5 + $0x3e0] ss:$8 sps:$4 sm:$0xff]  }
  0xcd   :  { %1842 = vmatmul.mubr.bf16.vlgmr.msra.gmra.mrb[8].mxu0 %v2811_v15  ;;  %v3298_v15 = vld [vmem:[#allocation5 + $0x660] ss:$8 sps:$4 sm:$0xff]  }
  0xce   :  { %1144 = vmatpush1.bf16.msra.mxu1 %v3207_v16  ;;  %1851 = vmatpush1.bf16.msra.mxu0 %v3212_v17  ;;  %v3303_v16 = vld [vmem:[#allocation5 + $0x3f4] ss:$8 sps:$4 sm:$0xff]  }
  0xcf   :  { %1145 = vmatprep.subr.bf16.mxu1 %v3217_v18  ;;  %1852 = vmatprep.subr.bf16.mxu0 %v3220_v19  ;;  %v3306_v17 = vld [vmem:[#allocation5 + $0x674] ss:$8 sps:$4 sm:$0xff]   ;;  %v3301_v18 = vld [vmem:[#allocation5 + $0x3f0] ss:$8 sps:$4 sm:$0xff]  }
  0xd0   :  { %1882 = vmatprep.mubr.bf16.mxu0 %v2814_v24  ;;  %v3304_v19 = vld [vmem:[#allocation5 + $0x670] ss:$8 sps:$4 sm:$0xff]  }
  0xd1   :  { %v3719_v24 = vld [vmem:[#allocation2 + $0x34] sm:$0xff] }
  0xd2   :  { %1146 = vmatpush1.bf16.msra.mxu1 %v3215_v20  ;;  %1853 = vmatpush1.bf16.msra.mxu0 %v3218_v22  ;;  %v3309_v20 = vld [vmem:[#allocation5 + $0x404] ss:$8 sps:$4 sm:$0xff]  }
  0xd3   :  { %1147 = vmatprep.subr.bf16.mxu1 %v3223_v23  ;;  %1854 = vmatprep.subr.bf16.mxu0 %v3226_v25  ;;  %v3314_v22 = vld [vmem:[#allocation5 + $0x684] ss:$8 sps:$4 sm:$0xff]   ;;  %v2813_v23 = vcombine.low %v3707_v21, %v3707_v21  ;;  %v3307_v25 = vld [vmem:[#allocation5 + $0x400] ss:$8 sps:$4 sm:$0xff]  }
  0xd4   :  { %v3323_v21 = vld [vmem:[#allocation5 + $0x424] ss:$8 sps:$4 sm:$0xff]  }
  0xd6   :  { %1148 = vmatpush1.bf16.msra.mxu1 %v3221_v26  ;;  %1855 = vmatpush1.bf16.msra.mxu0 %v3224_v27  ;;  %v3312_v26 = vld [vmem:[#allocation5 + $0x680] ss:$8 sps:$4 sm:$0xff]   ;;  %v3317_v27 = vld [vmem:[#allocation5 + $0x414] ss:$8 sps:$4 sm:$0xff]  }
  0xd7   :  { %1149 = vmatprep.subr.bf16.mxu1 %v3229_v28  ;;  %1856 = vmatprep.subr.bf16.mxu0 %v3232_v29  ;;  %v3320_v28 = vld [vmem:[#allocation5 + $0x694] ss:$8 sps:$4 sm:$0xff]   ;;  %v2816_v29 = vcombine.high %v3719_v24, %v3719_v24 }
  0xda   :  { %1150 = vmatpush1.bf16.msra.mxu1 %v3227_v30  ;;  %1857 = vmatpush1.bf16.msra.mxu0 %v3230_v31  ;;  %v3315_v30 = vld [vmem:[#allocation5 + $0x410] ss:$8 sps:$4 sm:$0xff]  }
  0xdb   :  { %1151 = vmatprep.subr.bf16.mxu1 %v3235_v32  ;;  %1858 = vmatprep.subr.bf16.mxu0 %v3238_v33  ;;  %v3318_v31 = vld [vmem:[#allocation5 + $0x690] ss:$8 sps:$4 sm:$0xff]   ;;  %v3326_v32 = vld [vmem:[#allocation5 + $0x6a4] ss:$8 sps:$4 sm:$0xff]   ;;  %v3321_v33 = vld [vmem:[#allocation5 + $0x420] ss:$8 sps:$4 sm:$0xff]  }
  0xde   :  { %1152 = vmatpush1.bf16.msra.mxu1 %v3233_v34  ;;  %1859 = vmatpush1.bf16.msra.mxu0 %v3236_v35  ;;  %v3324_v34 = vld [vmem:[#allocation5 + $0x6a0] ss:$8 sps:$4 sm:$0xff]   ;;  %v3329_v35 = vld [vmem:[#allocation5 + $0x434] ss:$8 sps:$4 sm:$0xff]  }
  0xdf   :  { %1153 = vmatprep.subr.bf16.mxu1 %v3241_v36  ;;  %1860 = vmatprep.subr.bf16.mxu0 %v3244_v37  ;;  %v3332_v36 = vld [vmem:[#allocation5 + $0x6b4] ss:$8 sps:$4 sm:$0xff]   ;;  %v3327_v37 = vld [vmem:[#allocation5 + $0x430] ss:$8 sps:$4 sm:$0xff]  }
  0xe2   :  { %1154 = vmatpush1.bf16.msra.mxu1 %v3239_v38  ;;  %1861 = vmatpush1.bf16.msra.mxu0 %v3242_v39  ;;  %v3330_v38 = vld [vmem:[#allocation5 + $0x6b0] ss:$8 sps:$4 sm:$0xff]   ;;  %v3335_v39 = vld [vmem:[#allocation5 + $0x444] ss:$8 sps:$4 sm:$0xff]  }
  0xe3   :  { %1155 = vmatprep.subr.bf16.mxu1 %v3247_v40  ;;  %1862 = vmatprep.subr.bf16.mxu0 %v3250_v41  ;;  %v3338_v40 = vld [vmem:[#allocation5 + $0x6c4] ss:$8 sps:$4 sm:$0xff]   ;;  %v3333_v41 = vld [vmem:[#allocation5 + $0x440] ss:$8 sps:$4 sm:$0xff]  }
  0xe6   :  { %1156 = vmatpush1.bf16.msra.mxu1 %v3245_v42  ;;  %1863 = vmatpush1.bf16.msra.mxu0 %v3248_v43  ;;  %v3336_v42 = vld [vmem:[#allocation5 + $0x6c0] ss:$8 sps:$4 sm:$0xff]   ;;  %v3341_v43 = vld [vmem:[#allocation5 + $0x454] ss:$8 sps:$4 sm:$0xff]  }
  0xe7   :  { %1157 = vmatprep.subr.bf16.mxu1 %v3253_v44  ;;  %1864 = vmatprep.subr.bf16.mxu0 %v3256_v45  ;;  %v3344_v44 = vld [vmem:[#allocation5 + $0x6d4] ss:$8 sps:$4 sm:$0xff]   ;;  %v3339_v45 = vld [vmem:[#allocation5 + $0x450] ss:$8 sps:$4 sm:$0xff]  }
  0xea   :  { %1158 = vmatpush1.bf16.msra.mxu1 %v3251_v46  ;;  %1865 = vmatpush1.bf16.msra.mxu0 %v3254_v47  ;;  %v3342_v46 = vld [vmem:[#allocation5 + $0x6d0] ss:$8 sps:$4 sm:$0xff]   ;;  %v3347_v47 = vld [vmem:[#allocation5 + $0x464] ss:$8 sps:$4 sm:$0xff]  }
  0xeb   :  { %1168 = vmatprep.subr.bf16.mxu1 %v3261_v48  ;;  %1866 = vmatprep.subr.bf16.mxu0 %v3264_v49  ;;  %v3350_v48 = vld [vmem:[#allocation5 + $0x6e4] ss:$8 sps:$4 sm:$0xff]   ;;  %v3345_v49 = vld [vmem:[#allocation5 + $0x460] ss:$8 sps:$4 sm:$0xff]  }
  0xed   :  { %1160 = vmatmul.mubr.bf16.vlgmr.msra.gmra.mrb[4].mxu1 %v2711_v51  ;;  %v3353_v51 = vld [vmem:[#allocation5 + $0x474] ss:$8 sps:$4 sm:$0xff]  }
  0xee   :  { %1169 = vmatpush1.bf16.msra.mxu1 %v3259_v50  ;;  %1867 = vmatpush1.bf16.msra.mxu0 %v3262_v52  ;;  %v3348_v50 = vld [vmem:[#allocation5 + $0x6e0] ss:$8 sps:$4 sm:$0xff]   ;;  %v3356_v52 = vld [vmem:[#allocation5 + $0x6f4] ss:$8 sps:$4 sm:$0xff]  }
  0xef   :  { %1170 = vmatprep.subr.bf16.mxu1 %v3267_v54  ;;  %1868 = vmatprep.subr.bf16.mxu0 %v3270_v55  ;;  %v3351_v54 = vld [vmem:[#allocation5 + $0x470] ss:$8 sps:$4 sm:$0xff]  }
  0xf0   :  { %1200 = vmatprep.mubr.bf16.mxu1 %v2714_v59  ;;  %v3354_v55 = vld [vmem:[#allocation5 + $0x6f0] ss:$8 sps:$4 sm:$0xff]   ;;  %v3359_v59 = vld [vmem:[#allocation5 + $0x700] ss:$8 sps:$4 sm:$0xff]  }
  0xf2   :  { %1171 = vmatpush1.bf16.msra.mxu1 %v3265_v56  ;;  %1869 = vmatpush1.bf16.msra.mxu0 %v3268_v57  ;;  %v3361_v56 = vld [vmem:[#allocation5 + $0x704] ss:$8 sps:$4 sm:$0xff]   ;;  %v2713_v57 = vcombine.low %v3713_v53, %v3713_v53 }
  0xf3   :  { %1172 = vmatprep.subr.bf16.mxu1 %v3273_v60  ;;  %1870 = vmatprep.subr.bf16.mxu0 %v3276_v61  ;;  %v3364_v60 = vld [vmem:[#allocation5 + $0x714] ss:$8 sps:$4 sm:$0xff]   ;;  %v3362_v61 = vld [vmem:[#allocation5 + $0x710] ss:$8 sps:$4 sm:$0xff]   ;;  %v3373_v53 = vld [vmem:[#allocation5 + $0x744] ss:$8 sps:$4 sm:$0xff]  }
  0xf6   :  { %1173 = vmatpush1.bf16.msra.mxu1 %v3271_v58  ;;  %1871 = vmatpush1.bf16.msra.mxu0 %v3274_v62  ;;  %v3367_v58 = vld [vmem:[#allocation5 + $0x724] ss:$8 sps:$4 sm:$0xff]   ;;  %v3365_v62 = vld [vmem:[#allocation5 + $0x720] ss:$8 sps:$4 sm:$0xff]  }
  0xf7   :  { %1174 = vmatprep.subr.bf16.mxu1 %v3279_v63  ;;  %1872 = vmatprep.subr.bf16.mxu0 %v3282_v1  ;;  %v3370_v63 = vld [vmem:[#allocation5 + $0x734] ss:$8 sps:$4 sm:$0xff]   ;;  %v3368_v1 = vld [vmem:[#allocation5 + $0x730] ss:$8 sps:$4 sm:$0xff]  }
  0xfa   :  { %1175 = vmatpush1.bf16.msra.mxu1 %v3277_v2  ;;  %1873 = vmatpush1.bf16.msra.mxu0 %v3280_v3  ;;  %v3371_v2 = vld [vmem:[#allocation5 + $0x740] ss:$8 sps:$4 sm:$0xff]   ;;  %v3376_v3 = vld [vmem:[#allocation5 + $0x754] ss:$8 sps:$4 sm:$0xff]  }
  0xfb   :  { %1176 = vmatprep.subr.bf16.mxu1 %v3285_v4  ;;  %1874 = vmatprep.subr.bf16.mxu0 %v3288_v5  ;;  %v3374_v4 = vld [vmem:[#allocation5 + $0x750] ss:$8 sps:$4 sm:$0xff]   ;;  %v3379_v5 = vld [vmem:[#allocation5 + $0x764] ss:$8 sps:$4 sm:$0xff]  }
  0xfe   :  { %1177 = vmatpush1.bf16.msra.mxu1 %v3283_v6  ;;  %1875 = vmatpush1.bf16.msra.mxu0 %v3286_v7 }
  0xff   :  { %1178 = vmatprep.subr.bf16.mxu1 %v3291_v8  ;;  %1876 = vmatprep.subr.bf16.mxu0 %v3294_v9 }
 0x102   :  { %1179 = vmatpush1.bf16.msra.mxu1 %v3289_v10  ;;  %1877 = vmatpush1.bf16.msra.mxu0 %v3292_v11 }
 0x103   :  { %1180 = vmatprep.subr.bf16.mxu1 %v3297_v12  ;;  %1878 = vmatprep.subr.bf16.mxu0 %v3300_v13  ;;  %v3377_v13 = vld [vmem:[#allocation5 + $0x760] ss:$8 sps:$4 sm:$0xff]  }
 0x106   :  { %1181 = vmatpush1.bf16.msra.mxu1 %v3295_v14  ;;  %1879 = vmatpush1.bf16.msra.mxu0 %v3298_v15 }
 0x107   :  { %1182 = vmatprep.subr.bf16.mxu1 %v3303_v16  ;;  %1880 = vmatprep.subr.bf16.mxu0 %v3306_v17  ;;  %v3382_v16 = vld [vmem:[#allocation5 + $0x774] ss:$8 sps:$4 sm:$0xff]  }
 0x10a   :  { %1183 = vmatpush1.bf16.msra.mxu1 %v3301_v18  ;;  %1881 = vmatpush1.bf16.msra.mxu0 %v3304_v19  ;;  %v3380_v18 = vld [vmem:[#allocation5 + $0x770] ss:$8 sps:$4 sm:$0xff]   ;;  %v2815_v19 = vcombine.low %v3719_v24, %v3719_v24 }
 0x10b   :  { %1184 = vmatprep.subr.bf16.mxu1 %v3309_v20  ;;  %1891 = vmatprep.subr.bf16.mxu0 %v3314_v22 }
 0x10d   :  { %1883 = vmatmul.mubr.bf16.vlgmr.msra.gmra.mrb[8].mxu0 %v2813_v23 }
 0x10e   :  { %1185 = vmatpush1.bf16.msra.mxu1 %v3307_v25  ;;  %1892 = vmatpush1.bf16.msra.mxu0 %v3312_v26 }
 0x10f   :  { %1186 = vmatprep.subr.bf16.mxu1 %v3317_v27  ;;  %1893 = vmatprep.subr.bf16.mxu0 %v3320_v28 }
 0x110   :  { %1923 = vmatprep.mubr.bf16.mxu0 %v2816_v29 }
 0x112   :  { %1187 = vmatpush1.bf16.msra.mxu1 %v3315_v30  ;;  %1894 = vmatpush1.bf16.msra.mxu0 %v3318_v31 }
 0x113   :  { %1188 = vmatprep.subr.bf16.mxu1 %v3323_v21  ;;  %1895 = vmatprep.subr.bf16.mxu0 %v3326_v32 }
 0x116   :  { %1189 = vmatpush1.bf16.msra.mxu1 %v3321_v33  ;;  %1896 = vmatpush1.bf16.msra.mxu0 %v3324_v34 }
 0x117   :  { %1190 = vmatprep.subr.bf16.mxu1 %v3329_v35  ;;  %1897 = vmatprep.subr.bf16.mxu0 %v3332_v36  ;;  %v3390_v35 = vld [vmem:[#allocation5 + $0x784] ss:$8 sps:$4 sm:$0xff]  }
 0x11a   :  { %1191 = vmatpush1.bf16.msra.mxu1 %v3327_v37  ;;  %1898 = vmatpush1.bf16.msra.mxu0 %v3330_v38  ;;  %v3385_v38 = vld [vmem:[#allocation7] sm:$0xff]  }
 0x11b   :  { %1192 = vmatprep.subr.bf16.mxu1 %v3335_v39  ;;  %1899 = vmatprep.subr.bf16.mxu0 %v3338_v40  ;;  %v3388_v39 = vld [vmem:[#allocation5 + $0x780] ss:$8 sps:$4 sm:$0xff]   ;;  %v3393_v40 = vld [vmem:[#allocation5 + $0x794] ss:$8 sps:$4 sm:$0xff]  }
 0x11e   :  { %1193 = vmatpush1.bf16.msra.mxu1 %v3333_v41  ;;  %1900 = vmatpush1.bf16.msra.mxu0 %v3336_v42  ;;  %v3391_v41 = vld [vmem:[#allocation5 + $0x790] ss:$8 sps:$4 sm:$0xff]   ;;  %v3396_v42 = vld [vmem:[#allocation5 + $0x7a4] ss:$8 sps:$4 sm:$0xff]  }
 0x11f   :  { %1194 = vmatprep.subr.bf16.mxu1 %v3341_v43  ;;  %1901 = vmatprep.subr.bf16.mxu0 %v3344_v44  ;;  %v3386_v43 = vld [vmem:[#allocation7 + $0x8] sm:$0xff]  }
 0x120   :  { %v3394_v44 = vld [vmem:[#allocation5 + $0x7a0] ss:$8 sps:$4 sm:$0xff]  }
 0x122   :  { %1195 = vmatpush1.bf16.msra.mxu1 %v3339_v45  ;;  %1902 = vmatpush1.bf16.msra.mxu0 %v3342_v46  ;;  %v3399_v45 = vld [vmem:[#allocation5 + $0x7b4] ss:$8 sps:$4 sm:$0xff]   ;;  %v3397_v46 = vld [vmem:[#allocation5 + $0x7b0] ss:$8 sps:$4 sm:$0xff]  }
 0x123   :  { %1196 = vmatprep.subr.bf16.mxu1 %v3347_v47  ;;  %1903 = vmatprep.subr.bf16.mxu0 %v3350_v48  ;;  %v3402_v47 = vld [vmem:[#allocation5 + $0x7c4] ss:$8 sps:$4 sm:$0xff]   ;;  %v3387_v48 = vld [vmem:[#allocation7 + $0x10] ss:$0 sps:$4 sm:$0xff]  }
 0x126   :  { %1197 = vmatpush1.bf16.msra.mxu1 %v3345_v49  ;;  %1904 = vmatpush1.bf16.msra.mxu0 %v3348_v50  ;;  %v3400_v49 = vld [vmem:[#allocation5 + $0x7c0] ss:$8 sps:$4 sm:$0xff]   ;;  %v3405_v50 = vld [vmem:[#allocation5 + $0x7d4] ss:$8 sps:$4 sm:$0xff]  }
 0x127   :  { %1198 = vmatprep.subr.bf16.mxu1 %v3353_v51  ;;  %1905 = vmatprep.subr.bf16.mxu0 %v3356_v52  ;;  %v3403_v51 = vld [vmem:[#allocation5 + $0x7d0] ss:$8 sps:$4 sm:$0xff]   ;;  %v3408_v52 = vld [vmem:[#allocation5 + $0x7e4] ss:$8 sps:$4 sm:$0xff]  }
 0x12a   :  { %1199 = vmatpush1.bf16.msra.mxu1 %v3351_v54  ;;  %1906 = vmatpush1.bf16.msra.mxu0 %v3354_v55  ;;  %v3406_v54 = vld [vmem:[#allocation5 + $0x7e0] ss:$8 sps:$4 sm:$0xff]   ;;  %v3411_v55 = vld [vmem:[#allocation5 + $0x7f4] ss:$8 sps:$4 sm:$0xff]  }
 0x12b   :  { %1907 = vmatprep.subr.bf16.mxu0 %v3361_v56  ;;  %v3414_v56 = vld [vmem:[#allocation5 + $0x804] ss:$8 sps:$4 sm:$0xff]  }
 0x12d   :  { %1201 = vmatmul.mubr.bf16.vlgmr.msra.gmra.mrb[4].mxu1 %v2713_v57  ;;  %v3412_v57 = vld [vmem:[#allocation5 + $0x800] ss:$8 sps:$4 sm:$0xff]  }
 0x12e   :  { %1908 = vmatpush1.bf16.msra.mxu0 %v3359_v59  ;;  %2005 = vmatprep.mubr.bf16.mxu1 %v3612_v0  ;;  %v3417_v59 = vld [vmem:[#allocation5 + $0x814] ss:$8 sps:$4 sm:$0xff]  }
 0x12f   :  { %1909 = vmatprep.subr.bf16.mxu0 %v3364_v60  ;;  %v3415_v60 = vld [vmem:[#allocation5 + $0x810] ss:$8 sps:$4 sm:$0xff]  }
 0x132   :  { %1910 = vmatpush1.bf16.msra.mxu0 %v3362_v61  ;;  %v3420_v61 = vld [vmem:[#allocation5 + $0x824] ss:$8 sps:$4 sm:$0xff]  }
 0x133   :  { %1911 = vmatprep.subr.bf16.mxu0 %v3367_v58  ;;  %v3418_v58 = vld [vmem:[#allocation5 + $0x820] ss:$8 sps:$4 sm:$0xff]  }
 0x136   :  { %1912 = vmatpush1.bf16.msra.mxu0 %v3365_v62  ;;  %v3423_v62 = vld [vmem:[#allocation5 + $0x834] ss:$8 sps:$4 sm:$0xff]  }
 0x137   :  { %1913 = vmatprep.subr.bf16.mxu0 %v3370_v63  ;;  %v3421_v63 = vld [vmem:[#allocation5 + $0x830] ss:$8 sps:$4 sm:$0xff]  }
 0x13a   :  { %1914 = vmatpush1.bf16.msra.mxu0 %v3368_v1  ;;  %v3426_v1 = vld [vmem:[#allocation5 + $0x844] ss:$8 sps:$4 sm:$0xff]  }
 0x13b   :  { %1915 = vmatprep.subr.bf16.mxu0 %v3373_v53  ;;  %v3424_v53 = vld [vmem:[#allocation5 + $0x840] ss:$8 sps:$4 sm:$0xff]  }
 0x13e   :  { %1916 = vmatpush1.bf16.msra.mxu0 %v3371_v2  ;;  %v3429_v2 = vld [vmem:[#allocation5 + $0x854] ss:$8 sps:$4 sm:$0xff]  }
 0x13f   :  { %1917 = vmatprep.subr.bf16.mxu0 %v3376_v3  ;;  %v3427_v3 = vld [vmem:[#allocation5 + $0x850] ss:$8 sps:$4 sm:$0xff]  }
 0x140   :  { %v203_v6 = vpop.f32.mrb[0].mxu0  ;;  %v341_v7 = vpop.f32.mrb[0].mxu1 }
 0x141   :  { %v1932_v8 = vpack.c.bf16 %v341_v7, %v203_v6  ;;  %v205_v9 = vpop.f32.mrb[1].mxu0  ;;  %v343_v10 = vpop.f32.mrb[1].mxu1  ;;  %v3435_v6 = vld [vmem:[#allocation5 + $0x874] ss:$8 sps:$4 sm:$0xff]   ;;  %v3433_v7 = vld [vmem:[#allocation5 + $0x870] ss:$8 sps:$4 sm:$0xff]  }
 0x142   :  { %v1933_v11 = vpack.c.bf16 %v343_v10, %v205_v9  ;;  %v207_v12 = vpop.f32.mrb[2].mxu0  ;;  %1918 = vmatpush1.bf16.msra.mxu0 %v3374_v4  ;;  %v345_v14 = vpop.f32.mrb[2].mxu1  ;;  %v3432_v4 = vld [vmem:[#allocation5 + $0x864] ss:$8 sps:$4 sm:$0xff]   ;;  %v3441_v10 = vld [vmem:[#allocation5 + $0x894] ss:$8 sps:$4 sm:$0xff]  }
 0x143   :  { %v208_v15 = vpop.f32.mrb[3].mxu0  ;;  %1919 = vmatprep.subr.bf16.mxu0 %v3379_v5  ;;  %v346_v17 = vpop.f32.mrb[3].mxu1  ;;  %v3430_v5 = vld [vmem:[#allocation5 + $0x860] ss:$8 sps:$4 sm:$0xff]   ;;  %v3438_v9 = vld [vmem:[#allocation5 + $0x884] ss:$8 sps:$4 sm:$0xff]  }
 0x144   :  { %1973 = vmatprep.subr.bf16.mxu1 %v1933_v11  ;;  %v3439_v11 = vld [vmem:[#allocation5 + $0x890] ss:$8 sps:$4 sm:$0xff]   ;;  %v3444_v12 = vld [vmem:[#allocation5 + $0x8a4] ss:$8 sps:$4 sm:$0xff]   ;;  %v3447_v14 = vld [vmem:[#allocation5 + $0x8b4] ss:$8 sps:$4 sm:$0xff]  }
 0x145   :  { %1974 = vmatpush1.bf16.msra.mxu1 %v1932_v8  ;;  %v3436_v8 = vld [vmem:[#allocation5 + $0x880] ss:$8 sps:$4 sm:$0xff]   ;;  %v3445_v15 = vld [vmem:[#allocation5 + $0x8b0] ss:$8 sps:$4 sm:$0xff]  }
 0x146   :  { %1920 = vmatpush1.bf16.msra.mxu0 %v3377_v13  ;;  %v3442_v13 = vld [vmem:[#allocation5 + $0x8a0] ss:$8 sps:$4 sm:$0xff]  }
 0x147   :  { %1921 = vmatprep.subr.bf16.mxu0 %v3382_v16  ;;  %v3450_v16 = vld [vmem:[#allocation5 + $0x8c4] ss:$8 sps:$4 sm:$0xff]   ;;  %v3448_v17 = vld [vmem:[#allocation5 + $0x8c0] ss:$8 sps:$4 sm:$0xff]  }
 0x14a   :  { %1922 = vmatpush1.bf16.msra.mxu0 %v3380_v18  ;;  %v3453_v18 = vld [vmem:[#allocation5 + $0x8d4] ss:$8 sps:$4 sm:$0xff]  }
 0x14b   :  { %2580 = vmatprep.subr.bf16.mxu0 %v3438_v9 }
 0x14d   :  { %1924 = vmatmul.mubr.bf16.vlgmr.msra.gmra.mrb[8].mxu0 %v2815_v19  ;;  %v3451_v19 = vld [vmem:[#allocation5 + $0x8d0] ss:$8 sps:$4 sm:$0xff]  }
 0x14e   :  { %2581 = vmatpush1.bf16.msra.mxu0 %v3436_v8  ;;  %v2062_v8 = vld [vmem:[#allocation8 + $0x90] sm:$0xff] }
 0x14f   :  { %2582 = vmatprep.subr.bf16.mxu0 %v3441_v10 }
 0x152   :  { %2583 = vmatpush1.bf16.msra.mxu0 %v3439_v11 }
 0x153   :  { %2584 = vmatprep.subr.bf16.mxu0 %v3444_v12 }
 0x156   :  { %2585 = vmatpush1.bf16.msra.mxu0 %v3442_v13 }
 0x157   :  { %2586 = vmatprep.subr.bf16.mxu0 %v3447_v14 }
 0x15a   :  { %2587 = vmatpush1.bf16.msra.mxu0 %v3445_v15 }
 0x15b   :  { %2588 = vmatprep.subr.bf16.mxu0 %v3450_v16  ;;  %v3459_v16 = vld [vmem:[#allocation5 + $0x8f4] ss:$8 sps:$4 sm:$0xff]  }
 0x15e   :  { %2589 = vmatpush1.bf16.msra.mxu0 %v3448_v17  ;;  %v3457_v17 = vld [vmem:[#allocation5 + $0x8f0] ss:$8 sps:$4 sm:$0xff]  }
 0x15f   :  { %2590 = vmatprep.subr.bf16.mxu0 %v3453_v18  ;;  %v3462_v18 = vld [vmem:[#allocation5 + $0x904] ss:$8 sps:$4 sm:$0xff]  }
 0x160   :  { %v479_v20 = vpop.f32.mrb[4].mxu0 }
 0x161   :  { %v481_v22 = vpop.f32.mrb[5].mxu0 }
 0x162   :  { %v483_v23 = vpop.f32.mrb[6].mxu0  ;;  %2591 = vmatpush1.bf16.msra.mxu0 %v3451_v19  ;;  %v3460_v19 = vld [vmem:[#allocation5 + $0x900] ss:$8 sps:$4 sm:$0xff]  }
 0x163   :  { %v484_v25 = vpop.f32.mrb[7].mxu0  ;;  %v2034_v23 = vld [vmem:[#allocation8] sm:$0xff] }
 0x164   :  { %v2035_v25 = vld [vmem:[#allocation8 + $0x8] sm:$0xff] }
 0x200   :  { %v1202_v26 = vpop.f32.mrb[4].mxu1 }
 0x201   :  { %v1934_v27 = vpack.c.bf16 %v1202_v26, %v479_v20  ;;  %v1204_v28 = vpop.f32.mrb[5].mxu1  ;;  %v3456_v20 = vld [vmem:[#allocation5 + $0x8e4] ss:$8 sps:$4 sm:$0xff]  }
 0x202   :  { %v1935_v29 = vpack.c.bf16 %v1204_v28, %v481_v22  ;;  %v1206_v30 = vpop.f32.mrb[6].mxu1  ;;  %v3454_v22 = vld [vmem:[#allocation5 + $0x8e0] ss:$8 sps:$4 sm:$0xff]   ;;  %2592 = vmatprep.subr.bf16.mxu0 %v3456_v20  ;;  %v3465_v20 = vld [vmem:[#allocation5 + $0x914] ss:$8 sps:$4 sm:$0xff]  }
 0x203   :  { %v1207_v31 = vpop.f32.mrb[7].mxu1  ;;  %2593 = vmatpush1.bf16.msra.mxu0 %v3454_v22  ;;  %v2037_v30 = vld [vmem:[#allocation8 + $0x18] sm:$0xff] }
 0x204   :  { %1975 = vmatprep.subr.bf16.mxu1 %v1935_v29  ;;  %v2054_v31 = vld [vmem:[#allocation8 + $0x50] sm:$0xff]  ;;  %2594 = vmatprep.subr.bf16.mxu0 %v3459_v16  ;;  %v3463_v22 = vld [vmem:[#allocation5 + $0x910] ss:$8 sps:$4 sm:$0xff]  }
 0x205   :  { %1976 = vmatpush1.bf16.msra.mxu1 %v1934_v27  ;;  %v2036_v27 = vld [vmem:[#allocation8 + $0x10] sm:$0xff] }
 0x207   :  { %2595 = vmatpush1.bf16.msra.mxu0 %v3457_v17 }
 0x208   :  { %2596 = vmatprep.subr.bf16.mxu0 %v3462_v18 }
 0x20b   :  { %2597 = vmatpush1.bf16.msra.mxu0 %v3460_v19 }
 0x20c   :  { %2598 = vmatprep.subr.bf16.mxu0 %v3465_v20 }
 0x20f   :  { %2599 = vmatpush1.bf16.msra.mxu0 %v3463_v22 }
 0x220   :  { %v1925_v21 = vpop.f32.mrb[8].mxu0 }
 0x221   :  { %v1936_v32 = vpack.c.bf16 %v1925_v21, %v1925_v21  ;;  %v1927_v33 = vpop.f32.mrb[9].mxu0 }
 0x222   :  { %v1937_v34 = vpack.c.bf16 %v1927_v33, %v1927_v33  ;;  %v1929_v24 = vpop.f32.mrb[10].mxu0  ;;  %v2056_v33 = vld [vmem:[#allocation8 + $0x60] sm:$0xff] }
 0x223   :  { %v1968_v36 = vsel %vm1966_vm0, %v1936_v32, 0  ;;  %v1930_v37 = vpop.f32.mrb[11].mxu0 }
 0x224   :  { %2916 = vmatprep.subr.msk.bf16.mxu1 %vm1966_vm0, %v1937_v34  ;;  %v2055_v34 = vld [vmem:[#allocation8 + $0x58] sm:$0xff] }
 0x225   :  { %1978 = vmatpush1.bf16.msra.mxu1 %v1968_v36  ;;  %v2057_v36 = vld [vmem:[#allocation8 + $0x68] sm:$0xff] }
 0x226   :  { %2272 = vmatprep.subr.bf16.mxu1 %v3390_v35 }
 0x228   :  { %2917 = vmatmul.mubr.msk.bf16.vlgmr.msra.gmra.mrb[8].mxu1 %vm1956_vm1, %v3385_v38 }
 0x229   :  { %2015 = vmatprep.mubr.bf16.mxu1 %v3612_v0  ;;  %2273 = vmatpush1.bf16.msra.mxu1 %v3388_v39 }
 0x22a   :  { %2274 = vmatprep.subr.bf16.mxu1 %v3393_v40 }
 0x22d   :  { %2275 = vmatpush1.bf16.msra.mxu1 %v3391_v41 }
 0x22e   :  { %2276 = vmatprep.subr.bf16.mxu1 %v3396_v42  ;;  %v2038_v42 = vld [vmem:[#allocation8 + $0x20] sm:$0xff] }
 0x230   :  { %2918 = vmatmul.mubr.msk.bf16.gmra.mrb[12].mxu1 %vm1956_vm1, %v3386_v43 }
 0x231   :  { %2025 = vmatprep.mubr.bf16.mxu1 %v3612_v0  ;;  %2277 = vmatpush1.bf16.msra.mxu1 %v3394_v44  ;;  %v3409_v0 = vld [vmem:[#allocation5 + $0x7f0] ss:$8 sps:$4 sm:$0xff]   ;;  %v2039_v44 = vld [vmem:[#allocation8 + $0x28] sm:$0xff] }
 0x232   :  { %2278 = vmatprep.subr.bf16.mxu1 %v3399_v45 }
 0x235   :  { %2279 = vmatpush1.bf16.msra.mxu1 %v3397_v46  ;;  %v2040_v46 = vld [vmem:[#allocation8 + $0x30] sm:$0xff] }
 0x236   :  { %2280 = vmatprep.subr.bf16.mxu1 %v3402_v47 }
 0x238   :  { %2919 = vmatmul.mubr.msk.bf16.gmra.mrb[16].mxu1 %vm1956_vm1, %v3387_v48 }
 0x239   :  { %2281 = vmatpush1.bf16.msra.mxu1 %v3400_v49 }
 0x23a   :  { %2282 = vmatprep.subr.bf16.mxu1 %v3405_v50  ;;  %v2041_v50 = vld [vmem:[#allocation8 + $0x38] sm:$0xff] }
 0x23d   :  { %2283 = vmatpush1.bf16.msra.mxu1 %v3403_v51  ;;  %v2058_v51 = vld [vmem:[#allocation8 + $0x70] sm:$0xff] }
 0x23e   :  { %2284 = vmatprep.subr.bf16.mxu1 %v3408_v52 }
 0x241   :  { %2285 = vmatpush1.bf16.msra.mxu1 %v3406_v54 }
 0x242   :  { %2286 = vmatprep.subr.bf16.mxu1 %v3411_v55  ;;  %v2060_v55 = vld [vmem:[#allocation8 + $0x80] sm:$0xff] }
 0x245   :  { %2287 = vmatpush1.bf16.msra.mxu1 %v3409_v0  ;;  %v2059_v0 = vld [vmem:[#allocation8 + $0x78] sm:$0xff] }
 0x246   :  { %2288 = vmatprep.subr.bf16.mxu1 %v3414_v56 }
 0x249   :  { %2289 = vmatpush1.bf16.msra.mxu1 %v3412_v57 }
 0x24a   :  { %2290 = vmatprep.subr.bf16.mxu1 %v3417_v59  ;;  %v2061_v59 = vld [vmem:[#allocation8 + $0x88] sm:$0xff] }
 0x24d   :  { %2291 = vmatpush1.bf16.msra.mxu1 %v3415_v60 }
 0x24e   :  { %2292 = vmatprep.subr.bf16.mxu1 %v3420_v61 }
 0x251   :  { %2293 = vmatpush1.bf16.msra.mxu1 %v3418_v58 }
 0x252   :  { %2294 = vmatprep.subr.bf16.mxu1 %v3423_v62 }
 0x255   :  { %2295 = vmatpush1.bf16.msra.mxu1 %v3421_v63 }
 0x256   :  { %2296 = vmatprep.subr.bf16.mxu1 %v3426_v1  ;;  %v2042_v1 = vld [vmem:[#allocation8 + $0x40] sm:$0xff] }
 0x259   :  { %2297 = vmatpush1.bf16.msra.mxu1 %v3424_v53  ;;  %v2043_v53 = vld [vmem:[#allocation8 + $0x48] sm:$0xff] }
 0x25a   :  { %2298 = vmatprep.subr.bf16.mxu1 %v3429_v2 }
 0x25d   :  { %2299 = vmatpush1.bf16.msra.mxu1 %v3427_v3 }
 0x25e   :  { %2300 = vmatprep.subr.bf16.mxu1 %v3432_v4 }
 0x261   :  { %2301 = vmatpush1.bf16.msra.mxu1 %v3430_v5 }
 0x262   :  { %2302 = vmatprep.subr.bf16.mxu1 %v3435_v6 }
 0x265   :  { %2303 = vmatpush1.bf16.msra.mxu1 %v3433_v7  ;;  %v2063_v7 = vld [vmem:[#allocation8 + $0x98] sm:$0xff] }
 0x2fb   :  { %v2007_v26 = vpop.f32.mrb[8].mxu1 }
 0x2fc   :  { %v2044_v28 = vmul.f32 %v2034_v23, %v2007_v26  ;;  %v2009_v29 = vpop.f32.mrb[9].mxu1  ;;  %v3468_v23 = vld [vmem:[#allocation5 + $0x924] ss:$8 sps:$4 sm:$0xff]   ;;  %v3471_v26 = vld [vmem:[#allocation5 + $0x934] ss:$8 sps:$4 sm:$0xff]  }
 0x2fd   :  { %v2045_v21 = vmul.f32 %v2035_v25, %v2009_v29  ;;  %v2011_v32 = vpop.f32.mrb[10].mxu1  ;;  %v3466_v25 = vld [vmem:[#allocation5 + $0x920] ss:$8 sps:$4 sm:$0xff]   ;;  %2600 = vmatprep.subr.bf16.mxu0 %v3468_v23 }
 0x2fe   :  { %v2046_v24 = vmul.f32 %v2036_v27, %v2011_v32  ;;  %v2013_v35 = vpop.f32.mrb[11].mxu1  ;;  %v2064_v38 = vadd.f32 %v2054_v31, %v2044_v28  ;;  %2601 = vmatpush1.bf16.msra.mxu0 %v3466_v25  ;;  %v3469_v27 = vld [vmem:[#allocation5 + $0x930] ss:$8 sps:$4 sm:$0xff]   ;;  %v3474_v28 = vld [vmem:[#allocation5 + $0x944] ss:$8 sps:$4 sm:$0xff]  }
 0x2ff   :  { %v2047_v37 = vmul.f32 %v2037_v30, %v2013_v35  ;;  %v2065_v40 = vadd.f32 %v2055_v34, %v2045_v21  ;;  %2602 = vmatprep.subr.bf16.mxu0 %v3471_v26  ;;  %v3472_v29 = vld [vmem:[#allocation5 + $0x940] ss:$8 sps:$4 sm:$0xff]   ;;  %v3477_v30 = vld [vmem:[#allocation5 + $0x954] ss:$8 sps:$4 sm:$0xff]   ;;  %v3475_v31 = vld [vmem:[#allocation5 + $0x950] ss:$8 sps:$4 sm:$0xff]   ;;  %v2570_v26 = vlaneseq }
 0x300   :  { %v2066_v39 = vadd.f32 %v2056_v33, %v2046_v24  ;;  %v3480_v21 = vld [vmem:[#allocation5 + $0x964] ss:$8 sps:$4 sm:$0xff]   ;;  %v3478_v32 = vld [vmem:[#allocation5 + $0x960] ss:$8 sps:$4 sm:$0xff]   ;;  %v3483_v33 = vld [vmem:[#allocation5 + $0x974] ss:$8 sps:$4 sm:$0xff]  }
 0x301   :  { %v2067_v41 = vadd.f32 %v2057_v36, %v2047_v37  ;;  %v3481_v34 = vld [vmem:[#allocation5 + $0x970] ss:$8 sps:$4 sm:$0xff]   ;;  %v2335_v36 = vld [vmem:[#allocation8 + $0xb0] sm:$0xff]  ;;  %vm2641_vm2 = vcmp.lt.s32.totalorder %v2570_v26, 256 }
 0x302   :  { %v2074_v43 = vpack.c.bf16 %v2066_v39, %v2064_v38  ;;  %2603 = vmatpush1.bf16.msra.mxu0 %v3469_v27  ;;  %v2333_v35 = vld [vmem:[#allocation8 + $0xa0] sm:$0xff]  ;;  %v2334_v38 = vld [vmem:[#allocation8 + $0xa8] sm:$0xff]  ;;  %v2336_v39 = vld [vmem:[#allocation8 + $0xb8] sm:$0xff]  ;;  %v2571_v27 = vshrl.u32 %v2570_v26, 7 }
 0x303   :  { %v2017_v45 = vpop.f32.mrb[12].mxu1  ;;  %v2075_v47 = vpack.c.bf16 %v2067_v41, %v2065_v40  ;;  %2604 = vmatprep.subr.bf16.mxu0 %v3474_v28 }
 0x304   :  { %v2048_v48 = vmul.f32 %v2038_v42, %v2017_v45  ;;  %v2019_v49 = vpop.f32.mrb[13].mxu1  ;;  %v2572_v28 = vsub.s32 0, %v2571_v27 }
 0x305   :  { %v2049_v52 = vmul.f32 %v2039_v44, %v2019_v49  ;;  %v2021_v54 = vpop.f32.mrb[14].mxu1  ;;  %2304 = vmatprep.mubr.bf16.mxu1 %v2075_v47  ;;  %v2338_v49 = vld [vmem:[#allocation8 + $0xc8] sm:$0xff] }
 0x306   :  { %v2050_v56 = vmul.f32 %v2040_v46, %v2021_v54  ;;  %v2023_v57 = vpop.f32.mrb[15].mxu1  ;;  %2305 = vmatmul.mubr.bf16.vlgmr.msra.gmra.mrb[20].mxu1 %v2074_v43  ;;  %v2068_v61 = vadd.f32 %v2058_v51, %v2048_v48  ;;  %2605 = vmatpush1.bf16.msra.mxu0 %v3472_v29  ;;  %v2337_v48 = vld [vmem:[#allocation8 + $0xc0] sm:$0xff]  ;;  %v2339_v51 = vld [vmem:[#allocation8 + $0xd0] sm:$0xff] }
 0x307   :  { %v2051_v60 = vmul.f32 %v2041_v50, %v2023_v57  ;;  %v2069_v62 = vadd.f32 %v2059_v0, %v2049_v52  ;;  %2606 = vmatprep.subr.bf16.mxu0 %v3477_v30  ;;  %v2408_v29 = vld [vmem:[#allocation8 + $0xf0] ss:$8 sm:$0x3]  ;;  %v2576_v30 = vsub.s32 1, %v2571_v27 }
 0x308   :  { %v2070_v58 = vadd.f32 %v2060_v55, %v2050_v56  ;;  %v2340_v55 = vld [vmem:[#allocation8 + $0xd8] sm:$0xff] }
 0x309   :  { %v2071_v63 = vadd.f32 %v2061_v59, %v2051_v60 }
 0x30a   :  { %v2076_v2 = vpack.c.bf16 %v2070_v58, %v2068_v61  ;;  %2607 = vmatpush1.bf16.msra.mxu0 %v3475_v31  ;;  %v3613_v31 = vmov 1966171168  }
 0x30b   :  { %v2027_v3 = vpop.f32.mrb[16].mxu1  ;;  %v2077_v4 = vpack.c.bf16 %v2071_v63, %v2069_v62  ;;  %2608 = vmatprep.subr.bf16.mxu0 %v3480_v21  ;;  %v2625_v21 = vunpack.c.l.s4 %v3613_v31 }
 0x30c   :  { %v2052_v5 = vmul.f32 %v2042_v1, %v2027_v3  ;;  %v2029_v6 = vpop.f32.mrb[17].mxu1  ;;  %v2341_v1 = vld [vmem:[#allocation8 + $0xe0] sm:$0xff] }
 0x30d   :  { %v2053_v9 = vmul.f32 %v2043_v53, %v2029_v6  ;;  %v2031_v10 = vpop.f32.mrb[18].mxu1  ;;  %2314 = vmatprep.mubr.bf16.mxu1 %v2077_v4  ;;  %v2342_v53 = vld [vmem:[#allocation8 + $0xe8] sm:$0xff] }
 0x30e   :  { %v2032_v11 = vpop.f32.mrb[19].mxu1  ;;  %2315 = vmatmul.mubr.bf16.gmra.mrb[24].mxu1 %v2076_v2  ;;  %v2072_v13 = vadd.f32 %v2062_v8, %v2052_v5  ;;  %2609 = vmatpush1.bf16.msra.mxu0 %v3478_v32  ;;  %v2573_v32 = vrot.slane %v2408_v29, %v2572_v28 }
 0x30f   :  { %v2073_v12 = vadd.f32 %v2063_v7, %v2053_v9  ;;  %2610 = vmatprep.subr.bf16.mxu0 %v3483_v33  ;;  %v2577_v33 = vrot.slane %v2408_v29, %v2576_v30 }
 0x310   :  { %v2078_v15 = vpack.c.bf16 %v2072_v13, %v2072_v13 }
 0x311   :  { %v2079_v14 = vpack.c.bf16 %v2073_v12, %v2073_v12 }
 0x312   :  { %2611 = vmatpush1.bf16.msra.mxu0 %v3481_v34  ;;  %v2626_v34 = vunpack.c.0.s8 %v2625_v21 }
 0x313   :  { %2324 = vmatprep.mubr.bf16.mxu1 %v2079_v14 }
 0x316   :  { %2325 = vmatmul.mubr.bf16.gmra.mrb[28].mxu1 %v2078_v15 }
 0x3d9   :  { %v2306_v24 = vpop.f32.mrb[20].mxu1 }
 0x3da   :  { %v2308_v37 = vpop.f32.mrb[21].mxu1  ;;  %v2343_v41 = vmul.f32 %v2333_v35, %v2306_v24 }
 0x3db   :  { %v2310_v40 = vpop.f32.mrb[22].mxu1  ;;  %v2344_v44 = vmul.f32 %v2334_v38, %v2308_v37  ;;  %v2629_v38 = vsub.s32 %v2626_v34, %v2571_v27 }
 0x3dc   :  { %v2345_v42 = vmul.f32 %v2335_v36, %v2310_v40  ;;  %v2312_v43 = vpop.f32.mrb[23].mxu1 }
 0x3dd   :  { %v2346_v45 = vmul.f32 %v2336_v39, %v2312_v43 }
 0x3de   :  { %v2353_v46 = vadd.f32 %v2345_v42, %v2343_v41 }
 0x3df   :  { %v2363_v47 = vadd.f32 %v2346_v45, %v2344_v44 }
 0x3e1   :  { %v2316_v50 = vpop.f32.mrb[24].mxu1 }
 0x3e2   :  { %v2347_v52 = vmul.f32 %v2337_v48, %v2316_v50  ;;  %v2318_v54 = vpop.f32.mrb[25].mxu1 }
 0x3e3   :  { %v2348_v0 = vmul.f32 %v2338_v49, %v2318_v54  ;;  %v2320_v56 = vpop.f32.mrb[26].mxu1 }
 0x3e4   :  { %v2354_v57 = vadd.f32 %v2353_v46, %v2347_v52  ;;  %v2349_v59 = vmul.f32 %v2339_v51, %v2320_v56  ;;  %v2322_v60 = vpop.f32.mrb[27].mxu1 }
 0x3e5   :  { %v2364_v61 = vadd.f32 %v2363_v47, %v2348_v0  ;;  %v2350_v58 = vmul.f32 %v2340_v55, %v2322_v60 }
 0x3e6   :  { %v2355_v62 = vadd.f32 %v2354_v57, %v2349_v59 }
 0x3e7   :  { %v2365_v63 = vadd.f32 %v2364_v61, %v2350_v58 }
 0x3e9   :  { %v2326_v2 = vpop.f32.mrb[28].mxu1 }
 0x3ea   :  { %v2351_v3 = vmul.f32 %v2341_v1, %v2326_v2  ;;  %v2328_v4 = vpop.f32.mrb[29].mxu1 }
 0x3eb   :  { %v2352_v5 = vmul.f32 %v2342_v53, %v2328_v4  ;;  %v2330_v6 = vpop.f32.mrb[30].mxu1 }
 0x3ec   :  { %v2356_v7 = vadd.f32 %v2355_v62, %v2351_v3  ;;  %v2331_v8 = vpop.f32.mrb[31].mxu1 }
 0x3ed   :  { %v2366_v9 = vadd.f32 %v2365_v63, %v2352_v5 }
 0x3ee   :  { %v2357_v10 = vrot.slane %v2356_v7, 4 }
 0x3ef   :  { %v2367_v11 = vrot.slane %v2366_v9, 4 }
 0x3f0   :  { %v2358_v12 = vadd.f32 %v2357_v10, %v2356_v7 }
 0x3f1   :  { %v2368_v13 = vadd.f32 %v2367_v11, %v2366_v9 }
 0x3f2   :  { %v2359_v14 = vrot.slane %v2358_v12, 2 }
 0x3f3   :  { %v2369_v15 = vrot.slane %v2368_v13, 2 }
 0x3f4   :  { %v2360_v16 = vadd.f32 %v2359_v14, %v2358_v12 }
 0x3f5   :  { %v2370_v17 = vadd.f32 %v2369_v15, %v2368_v13 }
 0x3f6   :  { %v2361_v18 = vrot.slane %v2360_v16, 1 }
 0x3f7   :  { %v2371_v19 = vrot.slane %v2370_v17, 1 }
 0x3f8   :  { %v2362_v20 = vadd.f32 %v2361_v18, %v2360_v16 }
 0x3f9   :  { %v2372_v22 = vadd.f32 %v2371_v19, %v2370_v17 }
 0x3fa   :  { %v2373_v25 = vpack.c.bf16 %v2362_v20, %v2362_v20 }
 0x3fb   :  { %v2374_v23 = vpack.c.bf16 %v2372_v22, %v2372_v22 }
 0x3fd   :  { %2612 = vmatprep.mubr.bf16.mxu0 %v2374_v23 }
 0x3fe   :  { %2613 = vmatmul.mubr.bf16.vlgmr.msra.gmra.mrb[12].mxu0 %v2373_v25 }
 0x4d1   :  { %v2614_v24 = vpop.f32.mrb[12].mxu0 }
 0x4d2   :  { %v2615_v35 = vadd.f32 %v2614_v24, %v2573_v32  ;;  %v2616_v36 = vpop.f32.mrb[13].mxu0 }
 0x4d3   :  { %v2617_v37 = vadd.f32 %v2616_v36, %v2577_v33  ;;  %v2618_v39 = vpop.f32.mrb[14].mxu0 }
 0x4d4   :  { %v2619_v40 = vpop.f32.mrb[15].mxu0 }
 0x4d5   :  { %v2623_v41 = vcombine.low %v2615_v35, %v2617_v37 }
 0x4d7   :  { %v2630_v42 = vrot.slane %v2623_v41, %v2629_v38 }
 0x4d9   :  { %v2637_v43 = vrot.slane %v2630_v42, %v2629_v38 }
 0x4db   :  { %2643 = vst.msk [vmem:[#allocation10] sm:$0x3] %vm2641_vm2, %v2637_v43 }
 0x4dc   :  { %3583 = shalt.err (!%p3580_p8)
}
 0x4dd   :  { %s3584_s17 = scalar_lea.hbm %s3749_s4, 32 }
 0x4de   :  { %p3585_p9 = scmp.ne.s32.totalorder %s3749_s4, %s3584_s17  ;;  %p3588_p10 = scmp.lt.u32.totalorder %s3584_s17, %s3749_s4 }
 0x4e0   :  { %p3590_p11 = pnand %p3588_p10, %p3585_p9 }
 0x4e2   :  { %3593 = shalt.err (!%p3590_p11)
}
 0x4e3   :  { %2653 = dma.vmem_to_hbm [thread:$0]  %s2651_s1, 32, %s3749_s4, [#allocation4]  }
 0x4e4   :  { %3600 = dma.done.wait [#allocation4], 32  }
 0x4e5   :  { %3601 = vsyncadd [#allocation4], 4294967264 }
 0x4e6   :  { %2657 = vsyncpa [#allocation3], 1 }
 0x4e7   :  { %2658 = vsyncpa [#allocation6], 1 }
 0x4e8   :  { %2659 = vsyncpa [#allocation9], 1 }
 0x4e9   :  { %2660 = vsyncpa [#allocation4], 1 }

</bundles_post_ra>
